<compile_context>
chip_gen: v6e
topology: v6e:2x2x1
jax: 0.10.0
libtpu: 0.0.40
codegen_flags: <defaults>
</compile_context>

<pallas_src>
import jax
import jax.numpy as jnp
import numpy as np
from jax import lax
from jax.experimental import pallas as pl
from jax.experimental.pallas import tpu as pltpu

_LP = 8  # left/right zero-pad width in the conv1 scratch (sublane aligned)


def bottleneck_kernel(x_ref, halo_ref, w1_ref, w2_ref, w3_ref, o_ref, pad_ref):
    """One TH-row slab of one image.

    x_ref    : (1, TH, W, Cin)          interior rows (also the residual)
    halo_ref : (1, 1, 2*W, Cin)         row above / row below (zeros at edges)
    w1_ref   : (Cin, P)                 conv1 1x1
    w2_ref   : (9*P, P)                 conv2 3x3, rows ordered (kh, kw, cin)
    w3_ref   : (P, 4*P)                 conv3 1x1
    o_ref    : (1, TH, W, Cin)
    pad_ref  : VMEM (TH+2, W+2*_LP, P)  persistent zero-padded conv1 output
    """
    _, TH, W, Cin = x_ref.shape
    P = w1_ref.shape[1]
    cdt = pad_ref.dtype

    x = x_ref[0]                                  # (TH, W, Cin)
    halo = halo_ref[...].reshape(2 * W, Cin)      # rows: [above, below]
    w1 = w1_ref[...]
    w2 = w2_ref[...]
    w3 = w3_ref[...]

    # ---- conv1: 1x1 + ReLU (interior rows + the two halo rows) -------------
    o1_int = jnp.dot(x.reshape(TH * W, Cin), w1,
                     preferred_element_type=jnp.float32)
    o1_int = jnp.maximum(o1_int, 0.0).astype(cdt).reshape(TH, W, P)
    o1_halo = jnp.dot(halo, w1, preferred_element_type=jnp.float32)
    o1_halo = jnp.maximum(o1_halo, 0.0).astype(cdt).reshape(2, W, P)

    # ---- write into the persistent zero-padded scratch ----------------------
    # Interior columns live at [_LP, _LP+W); only the zero border columns are
    # re-written each step (no per-step jnp.pad buffer).
    zcols = jnp.zeros((TH + 2, _LP, P), cdt)
    pad_ref[:, 0:_LP, :] = zcols
    pad_ref[:, _LP + W:_LP + W + _LP, :] = zcols
    pad_ref[0:1, _LP:_LP + W, :] = o1_halo[0:1]          # row above the slab
    pad_ref[1:TH + 1, _LP:_LP + W, :] = o1_int           # interior rows
    pad_ref[TH + 1:TH + 2, _LP:_LP + W, :] = o1_halo[1:2]  # row below the slab

    # ---- conv2: 3x3 as one K = 9*P im2col matmul + ReLU ---------------------
    padded = pad_ref[...]                                 # (TH+2, W+2*_LP, P)
    patches = [padded[kh:kh + TH, (_LP - 1) + kw:(_LP - 1) + kw + W, :]
               for kh in range(3) for kw in range(3)]
    slab = jnp.concatenate(patches, axis=-1).reshape(TH * W, 9 * P)
    o2 = jnp.dot(slab, w2, preferred_element_type=jnp.float32)
    o2 = jnp.maximum(o2, 0.0).astype(cdt)

    # ---- conv3: 1x1 -> 4P, residual add + ReLU (f32 elementwise) ------------
    o3 = jnp.dot(o2, w3, preferred_element_type=jnp.float32)
    y = o3.reshape(TH, W, Cin) + x.astype(jnp.float32)
    o_ref[0] = jnp.maximum(y, 0.0).astype(o_ref.dtype)


def _vmem_limit_bytes():
    cap = 64 * 1024 * 1024  # conservative fallback (v7x physical VMEM)
    try:
        info = pltpu.get_tpu_info()
        cap = int(getattr(info, "vmem_capacity_bytes", cap))
    except Exception:
        pass
    # ~48 MiB on v7x (64 MiB physical), ~96 MiB on v5e/v6e (128 MiB physical).
    return int(min(100 * 1024 * 1024, cap * 3 // 4))


def _pick_row_tile(H, W, Cin, P, elem_bytes, budget_bytes):
    """Largest row tile that keeps the per-step working set inside budget."""
    def est(th):
        io = 2 * 2 * th * W * Cin * elem_bytes              # in/out, double-buffered
        halo = 2 * 2 * W * Cin * elem_bytes
        wts = 2 * (Cin * P + 9 * P * P + 4 * P * P) * elem_bytes
        scr = (th + 2) * (W + 2 * _LP) * P * elem_bytes
        tmp = th * W * 10 * P * elem_bytes + th * W * 5 * P * 4  # im2col + f32 accs
        return io + halo + wts + scr + tmp
    for th in (128, 64, 32, 16, 8, 4, 2, 1):
        if H % th == 0 and est(th) <= budget_bytes:
            return th
    return 1


def bottleneck_v1b(x_nhwc, w1, w2_hwio, w3, *,
                   compute_dtype=jnp.bfloat16, row_tile=None):
    """x_nhwc: (N,H,W,Cin); w1: (Cin,P); w2_hwio: (3,3,P,P); w3: (P,4P).

    Output dtype follows the input dtype; matmul operands use `compute_dtype`
    with f32 accumulation.
    """
    N, H, W, Cin = x_nhwc.shape
    P = w1.shape[1]
    if Cin != 4 * P:
        raise ValueError(
            "BottleneckV1b with stride=1 and no downsample requires "
            f"inplanes == 4*planes, got Cin={Cin}, planes={P}")
    assert w1.shape == (Cin, P)
    assert w2_hwio.shape == (3, 3, P, P)
    assert w3.shape == (P, 4 * P)

    out_dtype = x_nhwc.dtype
    xc = x_nhwc.astype(compute_dtype)
    w1c = w1.astype(compute_dtype)
    w2c = w2_hwio.astype(compute_dtype).reshape(9 * P, P)   # rows: (kh, kw, cin)
    w3c = w3.astype(compute_dtype)

    vmem_limit = _vmem_limit_bytes()
    if row_tile is None:
        row_tile = _pick_row_tile(H, W, Cin, P,
                                  np.dtype(compute_dtype).itemsize,
                                  int(vmem_limit * 0.6))
    TH = int(row_tile)
    if H % TH != 0:
        raise ValueError(f"row_tile={TH} must divide H={H}")
    R = H // TH

    # Pre-gather the 1-row halo above/below each row tile (zero rows at the
    # image border).  Only 2/TH of the input is duplicated; every BlockSpec
    # stays non-overlapping and lane-dense.
    zrow = jnp.zeros((N, 1, W, Cin), compute_dtype)
    top = jnp.concatenate([zrow, xc[:, TH - 1:H - 1:TH]], axis=1)  # (N,R,W,Cin)
    bot = jnp.concatenate([xc[:, TH:H:TH], zrow], axis=1)          # (N,R,W,Cin)
    halo = jnp.stack([top, bot], axis=2).reshape(N, R, 2 * W, Cin)

    return pl.pallas_call(
        bottleneck_kernel,
        out_shape=jax.ShapeDtypeStruct((N, H, W, Cin), out_dtype),
        grid_spec=pltpu.PrefetchScalarGridSpec(
            num_scalar_prefetch=0,
            grid=(N, R),
            in_specs=[
                pl.BlockSpec((1, TH, W, Cin), lambda n, r: (n, r, 0, 0)),
                pl.BlockSpec((1, 1, 2 * W, Cin), lambda n, r: (n, r, 0, 0)),
                # Weights have a constant index map; accepting the default
                # double-buffering here (pl.Buffered(1) would reclaim one
                # weight buffer's worth of VMEM at planes >= 512).
                pl.BlockSpec((Cin, P), lambda n, r: (0, 0)),
                pl.BlockSpec((9 * P, P), lambda n, r: (0, 0)),
                pl.BlockSpec((P, 4 * P), lambda n, r: (0, 0)),
            ],
            out_specs=pl.BlockSpec((1, TH, W, Cin), lambda n, r: (n, r, 0, 0)),
            scratch_shapes=[pltpu.VMEM((TH + 2, W + 2 * _LP, P), compute_dtype)],
        ),
        compiler_params=pltpu.CompilerParams(
            dimension_semantics=("parallel", "parallel"),
            vmem_limit_bytes=vmem_limit,
        ),
    )(xc, halo, w1c, w2c, w3c)


def reference_bottleneck(x_nhwc, w1, w2_hwio, w3):
    """Pure-JAX f32 reference mirroring the PyTorch forward (NHWC / HWIO)."""
    dn = ("NHWC", "HWIO", "NHWC")
    out = lax.conv_general_dilated(x_nhwc, w1[None, None], (1, 1), "VALID",
                                   dimension_numbers=dn)
    out = jnp.maximum(out, 0.0)
    out = lax.conv_general_dilated(out, w2_hwio, (1, 1), [(1, 1), (1, 1)],
                                   dimension_numbers=dn)
    out = jnp.maximum(out, 0.0)
    out = lax.conv_general_dilated(out, w3[None, None], (1, 1), "VALID",
                                   dimension_numbers=dn)
    return jnp.maximum(out + x_nhwc, 0.0)


def _make_case(key, N, H, W, planes):
    inplanes = planes * 4
    kx, k1, k2, k3 = jax.random.split(key, 4)
    x_nchw = jax.random.normal(kx, (N, inplanes, H, W), jnp.float32)
    x_nhwc = jnp.transpose(x_nchw, (0, 2, 3, 1))
    # PyTorch OIHW conv weights -> kernel layouts (Kaiming-like scale).
    w1_oihw = jax.random.normal(k1, (planes, inplanes, 1, 1), jnp.float32) * (1.0 / np.sqrt(inplanes))
    w2_oihw = jax.random.normal(k2, (planes, planes, 3, 3), jnp.float32) * (1.0 / np.sqrt(9 * planes))
    w3_oihw = jax.random.normal(k3, (inplanes, planes, 1, 1), jnp.float32) * (1.0 / np.sqrt(planes))
    w1 = jnp.transpose(w1_oihw[:, :, 0, 0], (1, 0))     # (Cin, P)
    w2 = jnp.transpose(w2_oihw, (2, 3, 1, 0))           # (3, 3, P, P)  HWIO
    w3 = jnp.transpose(w3_oihw[:, :, 0, 0], (1, 0))     # (P, 4P)
    return x_nhwc, w1, w2, w3


if __name__ == "__main__":
    key = jax.random.PRNGKey(0)
    k_a, k_b = jax.random.split(key)

    # Case 1: f32 compute, two row tiles per image (exercises the conv halo),
    # Cin = 128 so the HBM output store is lane-dense.
    x, w1, w2, w3 = _make_case(k_a, N=2, H=16, W=16, planes=32)
    out = jax.block_until_ready(
        bottleneck_v1b(x, w1, w2, w3, compute_dtype=jnp.float32, row_tile=8))
    ref = jax.block_until_ready(reference_bottleneck(x, w1, w2, w3))
    np.testing.assert_allclose(np.asarray(out, np.float32), np.asarray(ref),
                               rtol=2e-3, atol=2e-3)

    # Case 2: bf16 MXU operands (f32 accumulate / elementwise), Cin = 256,
    # auto-picked row tile based on the chip's VMEM budget.
    x, w1, w2, w3 = _make_case(k_b, N=1, H=32, W=32, planes=64)
    out = jax.block_until_ready(
        bottleneck_v1b(x, w1, w2, w3, compute_dtype=jnp.bfloat16))
    ref = jax.block_until_ready(reference_bottleneck(x, w1, w2, w3))
    np.testing.assert_allclose(np.asarray(out, np.float32), np.asarray(ref),
                               rtol=5e-2, atol=5e-2)

    print("KERNEL_OK")
</pallas_src>

<mosaic_0001>
module attributes {stable_mosaic.version = 11 : i64} {
  func.func @bottleneck_kernel(%arg0: i32, %arg1: i32, %arg2: memref<1x8x16x128xf32, #tpu.memory_space<vmem>>, %arg3: memref<1x1x32x128xf32, #tpu.memory_space<vmem>>, %arg4: memref<128x32xf32, #tpu.memory_space<vmem>>, %arg5: memref<288x32xf32, #tpu.memory_space<vmem>>, %arg6: memref<32x128xf32, #tpu.memory_space<vmem>>, %arg7: memref<1x8x16x128xf32, #tpu.memory_space<vmem>>, %arg8: memref<10x32x32xf32, #tpu.memory_space<vmem>>) attributes {dimension_semantics = [#tpu.dimension_semantics<parallel>, #tpu.dimension_semantics<parallel>], iteration_bounds = array<i64: 2, 2>, scalar_prefetch = 0 : i64, scratch_operands = 1 : i64, tpu.core_type = #tpu.core_type<tc>, window_params = [{transform_indices = @transform_0, window_bounds = array<i64: 1, 8, 16, 128>}, {transform_indices = @transform_1, window_bounds = array<i64: 1, 1, 32, 128>}, {pipeline_mode = #tpu.pipeline_mode<synchronous>, transform_indices = @transform_2, window_bounds = array<i64: 128, 32>}, {pipeline_mode = #tpu.pipeline_mode<synchronous>, transform_indices = @transform_3, window_bounds = array<i64: 288, 32>}, {pipeline_mode = #tpu.pipeline_mode<synchronous>, transform_indices = @transform_4, window_bounds = array<i64: 32, 128>}, {transform_indices = @transform_5, window_bounds = array<i64: 1, 8, 16, 128>}]} {
    %c0 = arith.constant 0 : index
    %c0_0 = arith.constant 0 : index
    %c0_1 = arith.constant 0 : index
    %c0_2 = arith.constant 0 : index
    %0 = vector.load %arg2[%c0, %c0_0, %c0_1, %c0_2] : memref<1x8x16x128xf32, #tpu.memory_space<vmem>>, vector<1x8x16x128xf32>
    %1 = vector.shape_cast %0 : vector<1x8x16x128xf32> to vector<8x16x128xf32>
    %c0_3 = arith.constant 0 : index
    %c0_4 = arith.constant 0 : index
    %c0_5 = arith.constant 0 : index
    %c0_6 = arith.constant 0 : index
    %2 = vector.load %arg3[%c0_3, %c0_4, %c0_5, %c0_6] : memref<1x1x32x128xf32, #tpu.memory_space<vmem>>, vector<1x1x32x128xf32>
    %3 = vector.shape_cast %2 : vector<1x1x32x128xf32> to vector<32x128xf32>
    %c0_7 = arith.constant 0 : index
    %c0_8 = arith.constant 0 : index
    %4 = vector.load %arg4[%c0_7, %c0_8] : memref<128x32xf32, #tpu.memory_space<vmem>>, vector<128x32xf32>
    %c0_9 = arith.constant 0 : index
    %c0_10 = arith.constant 0 : index
    %5 = vector.load %arg5[%c0_9, %c0_10] : memref<288x32xf32, #tpu.memory_space<vmem>>, vector<288x32xf32>
    %c0_11 = arith.constant 0 : index
    %c0_12 = arith.constant 0 : index
    %6 = vector.load %arg6[%c0_11, %c0_12] : memref<32x128xf32, #tpu.memory_space<vmem>>, vector<32x128xf32>
    %7 = vector.shape_cast %1 : vector<8x16x128xf32> to vector<128x128xf32>
    %cst = arith.constant dense<0.000000e+00> : vector<128x32xf32>
    %8 = tpu.matmul %7, %4, %cst {dimension_numbers = #tpu.dot_dimension_numbers<[1], [0], [0], [1], [0, 0, 1, 1], [], []>} : vector<128x128xf32>, vector<128x32xf32>, vector<128x32xf32> -> vector<128x32xf32>
    %cst_13 = arith.constant 0.000000e+00 : f32
    %9 = vector.broadcast %cst_13 : f32 to vector<128x32xf32>
    %10 = arith.maximumf %8, %9 : vector<128x32xf32>
    %11 = vector.shape_cast %10 : vector<128x32xf32> to vector<8x16x32xf32>
    %cst_14 = arith.constant dense<0.000000e+00> : vector<32x32xf32>
    %12 = tpu.matmul %3, %4, %cst_14 {dimension_numbers = #tpu.dot_dimension_numbers<[1], [0], [0], [1], [0, 0, 1, 1], [], []>} : vector<32x128xf32>, vector<128x32xf32>, vector<32x32xf32> -> vector<32x32xf32>
    %cst_15 = arith.constant 0.000000e+00 : f32
    %13 = vector.broadcast %cst_15 : f32 to vector<32x32xf32>
    %14 = arith.maximumf %12, %13 : vector<32x32xf32>
    %15 = vector.shape_cast %14 : vector<32x32xf32> to vector<2x16x32xf32>
    %cst_16 = arith.constant 0.000000e+00 : f32
    %16 = vector.broadcast %cst_16 : f32 to vector<10x8x32xf32>
    %c0_17 = arith.constant 0 : index
    %c0_18 = arith.constant 0 : index
    %c0_19 = arith.constant 0 : index
    %17 = vector.load %arg8[%c0_17, %c0_18, %c0_19] : memref<10x32x32xf32, #tpu.memory_space<vmem>>, vector<10x8x32xf32>
    tpu.vector_store %arg8[%c0_17, %c0_18, %c0_19], %16 {strides = array<i32>} : memref<10x32x32xf32, #tpu.memory_space<vmem>>, vector<10x8x32xf32>,
    %c0_20 = arith.constant 0 : index
    %c24 = arith.constant 24 : index
    %c0_21 = arith.constant 0 : index
    %18 = vector.load %arg8[%c0_20, %c24, %c0_21] : memref<10x32x32xf32, #tpu.memory_space<vmem>>, vector<10x8x32xf32>
    tpu.vector_store %arg8[%c0_20, %c24, %c0_21], %16 {strides = array<i32>} : memref<10x32x32xf32, #tpu.memory_space<vmem>>, vector<10x8x32xf32>,
    %19 = vector.extract_strided_slice %15 {offsets = [0, 0, 0], sizes = [1, 16, 32], strides = [1, 1, 1]} : vector<2x16x32xf32> to vector<1x16x32xf32>
    %c0_22 = arith.constant 0 : index
    %c8 = arith.constant 8 : index
    %c0_23 = arith.constant 0 : index
    %20 = vector.load %arg8[%c0_22, %c8, %c0_23] : memref<10x32x32xf32, #tpu.memory_space<vmem>>, vector<1x16x32xf32>
    tpu.vector_store %arg8[%c0_22, %c8, %c0_23], %19 {strides = array<i32>} : memref<10x32x32xf32, #tpu.memory_space<vmem>>, vector<1x16x32xf32>,
    %c1 = arith.constant 1 : index
    %c8_24 = arith.constant 8 : index
    %c0_25 = arith.constant 0 : index
    %21 = vector.load %arg8[%c1, %c8_24, %c0_25] : memref<10x32x32xf32, #tpu.memory_space<vmem>>, vector<8x16x32xf32>
    tpu.vector_store %arg8[%c1, %c8_24, %c0_25], %11 {strides = array<i32>} : memref<10x32x32xf32, #tpu.memory_space<vmem>>, vector<8x16x32xf32>,
    %22 = vector.extract_strided_slice %15 {offsets = [1, 0, 0], sizes = [1, 16, 32], strides = [1, 1, 1]} : vector<2x16x32xf32> to vector<1x16x32xf32>
    %c9 = arith.constant 9 : index
    %c8_26 = arith.constant 8 : index
    %c0_27 = arith.constant 0 : index
    %23 = vector.load %arg8[%c9, %c8_26, %c0_27] : memref<10x32x32xf32, #tpu.memory_space<vmem>>, vector<1x16x32xf32>
    tpu.vector_store %arg8[%c9, %c8_26, %c0_27], %22 {strides = array<i32>} : memref<10x32x32xf32, #tpu.memory_space<vmem>>, vector<1x16x32xf32>,
    %c0_28 = arith.constant 0 : index
    %c0_29 = arith.constant 0 : index
    %c0_30 = arith.constant 0 : index
    %24 = vector.load %arg8[%c0_28, %c0_29, %c0_30] : memref<10x32x32xf32, #tpu.memory_space<vmem>>, vector<10x32x32xf32>
    %25 = vector.extract_strided_slice %24 {offsets = [0, 7, 0], sizes = [8, 16, 32], strides = [1, 1, 1]} : vector<10x32x32xf32> to vector<8x16x32xf32>
    %26 = vector.extract_strided_slice %24 {offsets = [0, 8, 0], sizes = [8, 16, 32], strides = [1, 1, 1]} : vector<10x32x32xf32> to vector<8x16x32xf32>
    %27 = vector.extract_strided_slice %24 {offsets = [0, 9, 0], sizes = [8, 16, 32], strides = [1, 1, 1]} : vector<10x32x32xf32> to vector<8x16x32xf32>
    %28 = vector.extract_strided_slice %24 {offsets = [1, 7, 0], sizes = [8, 16, 32], strides = [1, 1, 1]} : vector<10x32x32xf32> to vector<8x16x32xf32>
    %29 = vector.extract_strided_slice %24 {offsets = [1, 8, 0], sizes = [8, 16, 32], strides = [1, 1, 1]} : vector<10x32x32xf32> to vector<8x16x32xf32>
    %30 = vector.extract_strided_slice %24 {offsets = [1, 9, 0], sizes = [8, 16, 32], strides = [1, 1, 1]} : vector<10x32x32xf32> to vector<8x16x32xf32>
    %31 = vector.extract_strided_slice %24 {offsets = [2, 7, 0], sizes = [8, 16, 32], strides = [1, 1, 1]} : vector<10x32x32xf32> to vector<8x16x32xf32>
    %32 = vector.extract_strided_slice %24 {offsets = [2, 8, 0], sizes = [8, 16, 32], strides = [1, 1, 1]} : vector<10x32x32xf32> to vector<8x16x32xf32>
    %33 = vector.extract_strided_slice %24 {offsets = [2, 9, 0], sizes = [8, 16, 32], strides = [1, 1, 1]} : vector<10x32x32xf32> to vector<8x16x32xf32>
    %34 = tpu.concatenate %25, %26, %27, %28, %29, %30, %31, %32, %33 in 2 : vector<8x16x32xf32>, vector<8x16x32xf32>, vector<8x16x32xf32>, vector<8x16x32xf32>, vector<8x16x32xf32>, vector<8x16x32xf32>, vector<8x16x32xf32>, vector<8x16x32xf32>, vector<8x16x32xf32> -> vector<8x16x288xf32>
    %35 = vector.shape_cast %34 : vector<8x16x288xf32> to vector<128x288xf32>
    %cst_31 = arith.constant dense<0.000000e+00> : vector<128x32xf32>
    %36 = tpu.matmul %35, %5, %cst_31 {dimension_numbers = #tpu.dot_dimension_numbers<[1], [0], [0], [1], [0, 0, 1, 1], [], []>} : vector<128x288xf32>, vector<288x32xf32>, vector<128x32xf32> -> vector<128x32xf32>
    %cst_32 = arith.constant 0.000000e+00 : f32
    %37 = vector.broadcast %cst_32 : f32 to vector<128x32xf32>
    %38 = arith.maximumf %36, %37 : vector<128x32xf32>
    %cst_33 = arith.constant dense<0.000000e+00> : vector<128x128xf32>
    %39 = tpu.matmul %38, %6, %cst_33 {dimension_numbers = #tpu.dot_dimension_numbers<[1], [0], [0], [1], [0, 0, 1, 1], [], []>} : vector<128x32xf32>, vector<32x128xf32>, vector<128x128xf32> -> vector<128x128xf32>
    %40 = vector.shape_cast %39 : vector<128x128xf32> to vector<8x16x128xf32>
    %41 = arith.addf %40, %1 : vector<8x16x128xf32>
    %cst_34 = arith.constant 0.000000e+00 : f32
    %42 = vector.broadcast %cst_34 : f32 to vector<8x16x128xf32>
    %43 = arith.maximumf %41, %42 : vector<8x16x128xf32>
    %c0_35 = arith.constant 0 : index
    %c0_36 = arith.constant 0 : index
    %c0_37 = arith.constant 0 : index
    %c0_38 = arith.constant 0 : index
    %44 = vector.load %arg7[%c0_35, %c0_36, %c0_37, %c0_38] : memref<1x8x16x128xf32, #tpu.memory_space<vmem>>, vector<1x8x16x128xf32>
    %45 = vector.shape_cast %44 : vector<1x8x16x128xf32> to vector<8x16x128xf32>
    %46 = vector.shape_cast %43 : vector<8x16x128xf32> to vector<1x8x16x128xf32>
    tpu.vector_store %arg7[%c0_35, %c0_36, %c0_37, %c0_38], %46 {strides = array<i32>} : memref<1x8x16x128xf32, #tpu.memory_space<vmem>>, vector<1x8x16x128xf32>,
    return
  }
  func.func @transform_0(%arg0: i32, %arg1: i32) -> (i32, i32, i32, i32) {
    %c0_i32 = arith.constant 0 : i32
    %c0_i32_0 = arith.constant 0 : i32
    %c0_i32_1 = arith.constant 0 : i32
    return %arg0, %arg1, %c0_i32, %c0_i32_0 : i32, i32, i32, i32
  }
  func.func @transform_1(%arg0: i32, %arg1: i32) -> (i32, i32, i32, i32) {
    %c0_i32 = arith.constant 0 : i32
    %c0_i32_0 = arith.constant 0 : i32
    %c0_i32_1 = arith.constant 0 : i32
    return %arg0, %arg1, %c0_i32, %c0_i32_0 : i32, i32, i32, i32
  }
  func.func @transform_2(%arg0: i32, %arg1: i32) -> (i32, i32) {
    %c0_i32 = arith.constant 0 : i32
    %c0_i32_0 = arith.constant 0 : i32
    %c0_i32_1 = arith.constant 0 : i32
    return %c0_i32, %c0_i32_0 : i32, i32
  }
  func.func @transform_3(%arg0: i32, %arg1: i32) -> (i32, i32) {
    %c0_i32 = arith.constant 0 : i32
    %c0_i32_0 = arith.constant 0 : i32
    %c0_i32_1 = arith.constant 0 : i32
    return %c0_i32, %c0_i32_0 : i32, i32
  }
  func.func @transform_4(%arg0: i32, %arg1: i32) -> (i32, i32) {
    %c0_i32 = arith.constant 0 : i32
    %c0_i32_0 = arith.constant 0 : i32
    %c0_i32_1 = arith.constant 0 : i32
    return %c0_i32, %c0_i32_0 : i32, i32
  }
  func.func @transform_5(%arg0: i32, %arg1: i32) -> (i32, i32, i32, i32) {
    %c0_i32 = arith.constant 0 : i32
    %c0_i32_0 = arith.constant 0 : i32
    %c0_i32_1 = arith.constant 0 : i32
    return %arg0, %arg1, %c0_i32, %c0_i32_0 : i32, i32, i32, i32
  }
}

</mosaic_0001>

<bundles_post_ra>
// kernel: tpu_custom_call.1
= control target key start
LH: loop header
LB: loop body
LE: loop exit
PB: predicated region body
PF: predicated region fallthrough
CT: control target
= control target key end

     0   :  { %10 = vsyncpa [#allocation4], 0  ;;  %s4698_s0 = inlined_call_operand.vmem [shape: f32[2,16,16,128], index: 0, kind: input, shape index: {}]   ;;  %s4699_s1 = inlined_call_operand.hbm [shape: f32[2,2,32,128], index: 1, kind: input, shape index: {}]   ;;  %s4700_s2 = inlined_call_operand.vmem [shape: f32[128,32], index: 2, kind: input, shape index: {}]   ;;  %s4701_s3 = inlined_call_operand.vmem [shape: f32[288,32], index: 3, kind: input, shape index: {}]   ;;  %s4702_s4 = inlined_call_operand.vmem [shape: f32[32,128], index: 4, kind: input, shape index: {}]   ;;  %s4703_s5 = inlined_call_operand.hbm [shape: f32[2,16,16,128], index: 5, kind: output, shape index: {}]  }
   0x1   :  { %12 = vsyncpa [#allocation4 + $0x1], 0 }
   0x2   :  { %13 = vsyncpa [#allocation5], 0 }
   0x3   :  { %15 = vsyncpa [#allocation5 + $0x1], 0  ;;  %s3367_s18 = smov 0   ;;  %s3369_s19 = smov 0  }
   0x4   :  { %s3371_s20 = smov 0   ;;  %s3373_s21 = smov 0  }
   0x5   :  { %s3375_s22 = smov 0   ;;  %s3377_s23 = smov 0  }
   0x6   :  { %s3379_s24 = smov 0   ;;  %s3381_s25 = smov 0  }
   0x7 LB: > { %4710 = sst [smem:[#allocation9_spill]] %s3297_s18  ;;  %s2341_s26 = sadd.s32 4294967295, %s3325_s25   ;;  %s3325_s25 = sphi %s3381_s25, %s21_s25   ;;  %s3321_s24 = sphi %s3379_s24, %s4731_s24   ;;  %s3317_s23 = sphi %s3377_s23, %s4725_s23   ;;  %s3313_s22 = sphi %s3375_s22, %s4730_s22   ;;  %s3309_s21 = sphi %s3373_s21, %s4724_s21   ;;  %s3305_s20 = sphi %s3371_s20, %s4729_s20   ;;  %s3301_s19 = sphi %s3369_s19, %s4728_s19   ;;  %s3297_s18 = sphi %s3367_s18, %s4727_s18  }
   0x8   : > { %4711 = sst [smem:[#allocation10_spill]] %s3317_s23  ;;  %s2342_s27 = sadd.s32 4294967294, %s3325_s25  }
   0x9   : > { %s30_s28 = sadd.s32 1, %s3317_s23  ;;  %s33_s29 = sadd.s32 1, %s3321_s24 }
   0xa   : > { %p31_p0 = scmp.ge.s32.totalorder %s30_s28, 2  ;;  %s70_s30 = sadd.s32 1, %s3305_s20 }
   0xb   : > { %p77_p1 = scmp.ne.s32.totalorder %s3305_s20, %s3301_s19  ;;  %p78_p2 = scmp.eq.s32.totalorder %s3325_s25, 0 }
   0xc   : > { %s4733_s28 = smov (%p31_p0, %s30_s28), 0  ;;  %s4735_s29 = smov (!%p31_p0, %s33_s29), %s3321_s24 }
   0xd   : > { %4712 = sst [smem:[#allocation11_spill]] %s4733_s28  ;;  %s66_s6 = ssub.s32 %s3317_s23, %s4733_s28 }
   0xe   : > { %p3420_p3 = por %p78_p2, %p77_p1  ;;  %p35_p4 = scmp.ge.s32.totalorder %s4735_s29, 2 }
   0xf   : > { %p83_p5 = scmp.ne.s32.totalorder %s3301_s19, %s3297_s18  ;;  %p84_p6 = scmp.eq.s32.totalorder %s2341_s26, 0 }
  0x10   : > { %p172_p7 = scmp.eq.s32.totalorder %s2341_s26, 3  ;;  %s4737_s29 = smov (%p35_p4, %s4735_s29), 0 }
  0x11   : > { %4714 = sst [smem:[#allocation12_spill]] %s4737_s29  ;;  %p3428_p8 = por %p84_p6, %p83_p5 }
  0x12   : > { %p3432_p9 = por %p172_p7, %p77_p1  ;;  %s65_s10 = ssub.s32 %s3321_s24, %s4737_s29 }
  0x13   : > { %p178_p10 = scmp.eq.s32.totalorder %s2342_s27, 3  ;;  %s67_s11 = sor.u32 %s66_s6, %s65_s10 }
  0x14   : > { %p68_p11 = scmp.eq.s32.totalorder %s67_s11, 0  ;;  %p2738_p13 = scmp.lt.s32.totalorder %s3325_s25, 4 }
  0x15   : > { %p3438_p12 = por %p178_p10, %p83_p5  ;;  %s221_s13 = sand.u32 1, %s3305_s20  }
  0x16   : > { %s3445_s14 = scalar_select %p68_p11, %s3305_s20, %s70_s30  }
  0x17   : > { %s2345_s15 = sshll.u32 %s221_s13, 5  ;;  %s2346_s16 = sshll.u32 %s3317_s23, 2 }
  0x18   : > { %s2347_s17 = sshll.u32 %s3321_s24, 3  ;;  %s225_s26 = scalar_lea.vmem [#allocation3], %s2345_s15 }
  0x19   : > { %s234_s28 = sshll.u32 %s225_s26, 4  ;;  %s231_s18 = sadd.s32 %s2347_s17, %s2346_s16  ;;  %s235_s28 = int_to_ptr.vmem [resolvable:$true] %s234_s28 }
  0x1a   : > { %s2348_s29 = sshll.u32 %s231_s18, 7  ;;  %p3451_p0 = pnand %p2738_p13, %p3420_p3 }
  0x1b   : > { %s233_s11 = scalar_lea.hbm %s4699_s1, %s2348_s29  ;;  %s222_s30 = scalar_lea.sflag [#allocation4], %s221_s13 }
  0x1c   : > { %p3203_p1 = pneg %p3451_p0  ;;  %s3214_s23 = scalar_lea.vmem %s235_s28, 512 }
  0x1d   : > { %p3215_p2 = scmp.ne.s32.totalorder %s235_s28, %s3214_s23  ;;  %s3327_s15 = smov [#allocation3]  }
  0x1e   : > { %s3219_s16 = sshll.u32 %s3327_s15, 4  ;;  %s3220_s16 = int_to_ptr.vmem [resolvable:$false] %s3219_s16 }
  0x1f   : > { %p3217_p4 = pnand %p3215_p2, %p3203_p1  ;;  %s3221_s18 = scalar_lea.vmem %s3220_s16, 1024 }
  0x20   : > { %p3222_p3 = scmp.lt.s32.totalorder %s235_s28, %s3220_s16  ;;  %p3223_p6 = scmp.lt.s32.totalorder %s3221_s18, %s3214_s23 }
  0x21   : > { %p3218_p5 = pneg %p3217_p4 }
  0x22   : > { %p3224_p7 = por %p3223_p6, %p3222_p3 }
  0x24   : > { %p3225_p10 = pnand %p3224_p7, %p3218_p5 }
  0x26   : > { %3228 = shalt.err (!%p3225_p10)
}
  0x27   : > { %s3328_s7 = smov 128   ;;  %s3329_s29 = smov 8  }
  0x28   : > { %2733 = dma.hbm_to_vmem [thread:$0]  (!%p3451_p0), %s233_s11, 512, %s235_s28, %s222_s30, %s3328_s7, %s3328_s7, %s3329_s29  }
  0x29   : > { %p2349_p11 = scmp.ge.s32.totalorder %s3325_s25, 1  ;;  %p242_p13 = scmp.lt.s32.totalorder %s3325_s25, 5 }
  0x2b   : > { %p243_p1 = pnand %p2349_p11, %p242_p13 }
  0x2d   : > { %246 = sbr.rel (%p243_p1) target bundleno = 974 (0x3ce), region = 40 }
  0x32   : > { %s3465_s13 = sand.u32 1, %s3301_s19  }
  0x33   : > { %s2350_s23 = sshll.u32 %s3465_s13, 5  ;;  %s249_s17 = scalar_lea.sflag [#allocation4], %s3465_s13 }
  0x34   : > { %s3469_s26 = scalar_lea.vmem [#allocation3], %s2350_s23 }
  0x35   : > { %3288 = dma.done.wait (%p3428_p8), %s249_s17, 512  }
  0x36   : > { %3290 = vsyncadd (%p3428_p8), %s249_s17, 4294966784  ;;  %v336_v0 = vld [vmem:[%s4700_s2 + $0x78] sm:$0xff]  ;;  %v335_v1 = vld [vmem:[%s4700_s2 + $0x70] sm:$0xff]  ;;  %s2352_s7 = sshll.u32 %s3309_s21, 3  ;;  %p290_p8 = scmp.lt.s32.totalorder %s3313_s22, 1  ;;  %vm627_vm0 = vcmask 261120  }
  0x37   : > { %2568 = vmatprep.subr.mxu0 %v336_v0  ;;  %2624 = vmatprep.subr.mxu1 %v336_v0  ;;  %v334_v2 = vld [vmem:[%s4700_s2 + $0x68] sm:$0xff]  ;;  %v333_v3 = vld [vmem:[%s4700_s2 + $0x60] sm:$0xff]  ;;  %v332_v4 = vld [vmem:[%s4700_s2 + $0x58] sm:$0xff]  ;;  %p292_p0 = scmp.lt.s32.totalorder %s2352_s7, 15  ;;  %v3330_v36 = vmov 0.0   ;;  %vm831_vm1 = vcmask 1045504  }
  0x38   : > { %2569 = vmatpush3.msra.mxu0 %v336_v0  ;;  %2625 = vmatpush3.msra.mxu1 %v336_v0  ;;  %v331_v5 = vld [vmem:[%s4700_s2 + $0x50] sm:$0xff]  ;;  %v330_v6 = vld [vmem:[%s4700_s2 + $0x48] sm:$0xff]  ;;  %v329_v7 = vld [vmem:[%s4700_s2 + $0x40] sm:$0xff]  ;;  %s291_s10 = scalar_select %p290_p8, %s3313_s22, 1  ;;  %629 = vst.msk [vmem:[#allocation2 + $0x20] sm:$0xff] %vm627_vm0, %v3330_v36  ;;  %vm726_vm2 = vcmask 1046528  }
  0x39   : > { %2570 = vmatprep.subr.mxu0 %v335_v1  ;;  %2626 = vmatprep.subr.mxu1 %v335_v1  ;;  %s4739_s7 = smov (!%p292_p0, %s2352_s7), 15  ;;  %v328_v8 = vld [vmem:[%s4700_s2 + $0x38] sm:$0xff]  ;;  %v327_v9 = vld [vmem:[%s4700_s2 + $0x30] sm:$0xff]  ;;  %v326_v10 = vld [vmem:[%s4700_s2 + $0x28] sm:$0xff]  ;;  %628 = vst.msk [vmem:[#allocation2] sm:$0xff] %vm627_vm0, %v3330_v36  ;;  %vm1481_vm3 = vcmask 1040384  }
  0x3a   : > { %2571 = vmatpush3.msra.mxu0 %v335_v1  ;;  %2627 = vmatpush3.msra.mxu1 %v335_v1  ;;  %s2353_s16 = sshll.u32 %s4739_s7, 1  ;;  %s2354_s18 = sshll.u32 %s291_s10, 5  ;;  %v325_v11 = vld [vmem:[%s4700_s2 + $0x20] sm:$0xff]  ;;  %v324_v12 = vld [vmem:[%s4700_s2 + $0x18] sm:$0xff]  ;;  %v323_v13 = vld [vmem:[%s4700_s2 + $0x10] sm:$0xff]  ;;  %630 = vst.msk [vmem:[#allocation2 + $0x40] sm:$0xff] %vm627_vm0, %v3330_v36 }
  0x3b   : > { %2572 = vmatprep.subr.mxu0 %v334_v2  ;;  %2628 = vmatprep.subr.mxu1 %v334_v2  ;;  %s296_s27 = sadd.s32 %s2354_s18, %s2353_s16  ;;  %v322_v14 = vld [vmem:[%s4700_s2 + $0x8] sm:$0xff]  ;;  %v321_v15 = vld [vmem:[%s4700_s2] sm:$0xff]  ;;  %v319_v21 = vld [vmem:[%s3469_s26 + $0x10] sm:$0xff]  ;;  %631 = vst.msk [vmem:[#allocation2 + $0x60] sm:$0xff] %vm627_vm0, %v3330_v36  ;;  %s3332_s7 = smov 32   ;;  %vm1311_vm4 = vcmask 523264  }
  0x3c   : > { %2573 = vmatpush3.msra.mxu0 %v334_v2  ;;  %2629 = vmatpush3.msra.mxu1 %v334_v2  ;;  %s2355_s10 = sshll.u32 %s296_s27, 3  ;;  %v317_v17 = vld [vmem:[%s3469_s26] sm:$0xff]  ;;  %v318_v19 = vld [vmem:[%s3469_s26 + $0x8] sm:$0xff]  ;;  %v320_v23 = vld [vmem:[%s3469_s26 + $0x18] sm:$0xff]  ;;  %632 = vst.msk [vmem:[#allocation2 + $0x80] sm:$0xff] %vm627_vm0, %v3330_v36  ;;  %s3331_s26 = smov 96  }
  0x3d   : > { %2574 = vmatprep.subr.mxu0 %v333_v3  ;;  %2630 = vmatprep.subr.mxu1 %v333_v3  ;;  %s3526_s29 = scalar_lea.vmem %s4698_s0, %s2355_s10  ;;  %633 = vst.msk [vmem:[#allocation2 + $0xa0] sm:$0xff] %vm627_vm0, %v3330_v36  ;;  %634 = vst.msk [vmem:[#allocation2 + $0xc0] sm:$0xff] %vm627_vm0, %v3330_v36  ;;  %v372_v37 = vld [vmem:[%s4701_s3 + $0x118] sm:$0xff]  ;;  %v371_v38 = vld [vmem:[%s4701_s3 + $0x110] sm:$0xff]  ;;  %s3333_s23 = smov 64   ;;  %vm1336_vm5 = vcmask 785408  }
  0x3e   : > { %2575 = vmatpush3.msra.mxu0 %v333_v3  ;;  %2631 = vmatpush3.msra.mxu1 %v333_v3  ;;  %v301_v16 = vld [vmem:[%s3526_s29] sm:$0xff]  ;;  %v302_v18 = vld [vmem:[%s3526_s29 + $0x8] sm:$0xff]  ;;  %v303_v20 = vld [vmem:[%s3526_s29 + $0x10] sm:$0xff]  ;;  %635 = vst.msk [vmem:[#allocation2 + $0xe0] sm:$0xff] %vm627_vm0, %v3330_v36  ;;  %s2351_s16 = sshll.u32 %s3465_s13, 7  ;;  %s2395_s17 = sshll.u32 %s3309_s21, 4 }
  0x3f   : > { %2576 = vmatprep.subr.mxu0 %v332_v4  ;;  %2632 = vmatprep.subr.mxu1 %v332_v4  ;;  %v304_v22 = vld [vmem:[%s3526_s29 + $0x18] sm:$0xff]  ;;  %v305_v24 = vld [vmem:[%s3526_s29 + $0x20] sm:$0xff]  ;;  %v306_v25 = vld [vmem:[%s3526_s29 + $0x28] sm:$0xff]  ;;  %636 = vst.msk [vmem:[#allocation2 + $0x100] sm:$0xff] %vm627_vm0, %v3330_v36  ;;  %s4605_s18 = scalar_lea.vmem [#allocation6], %s2351_s16  ;;  %s2391_s28 = sshll.u32 %s3313_s22, 5 }
  0x40   : > { %2577 = vmatpush3.msra.mxu0 %v332_v4  ;;  %2633 = vmatpush3.msra.mxu1 %v332_v4  ;;  %v307_v26 = vld [vmem:[%s3526_s29 + $0x30] sm:$0xff]  ;;  %v308_v27 = vld [vmem:[%s3526_s29 + $0x38] sm:$0xff]  ;;  %v309_v28 = vld [vmem:[%s3526_s29 + $0x40] sm:$0xff]  ;;  %637 = vst.msk [vmem:[#allocation2 + $0x120] sm:$0xff] %vm627_vm0, %v3330_v36  ;;  %s2227_s27 = sadd.s32 %s2395_s17, %s2391_s28  ;;  %s2230_s6 = sshll.u32 %s4605_s18, 4  ;;  %s4638_s6 = int_to_ptr.vmem [resolvable:$true] %s2230_s6 }
  0x41   : > { %2578 = vmatprep.subr.mxu0 %v331_v5  ;;  %2634 = vmatprep.subr.mxu1 %v331_v5  ;;  %v310_v29 = vld [vmem:[%s3526_s29 + $0x48] sm:$0xff]  ;;  %v311_v30 = vld [vmem:[%s3526_s29 + $0x50] sm:$0xff]  ;;  %v312_v31 = vld [vmem:[%s3526_s29 + $0x58] sm:$0xff]  ;;  %638 = vst.msk [vmem:[#allocation2 + $0x18] sm:$0xff] %vm627_vm0, %v3330_v36  ;;  %s3229_s10 = scalar_lea.vmem %s4638_s6, 2048 }
  0x42   : > { %2579 = vmatpush3.msra.mxu0 %v331_v5  ;;  %2635 = vmatpush3.msra.mxu1 %v331_v5  ;;  %v313_v32 = vld [vmem:[%s3526_s29 + $0x60] sm:$0xff]  ;;  %v314_v33 = vld [vmem:[%s3526_s29 + $0x68] sm:$0xff]  ;;  %v315_v34 = vld [vmem:[%s3526_s29 + $0x70] sm:$0xff]  ;;  %639 = vst.msk [vmem:[#allocation2 + $0x38] sm:$0xff] %vm627_vm0, %v3330_v36  ;;  %p3230_p2 = scmp.ne.s32.totalorder %s4638_s6, %s3229_s10 }
  0x43   : > { %2580 = vmatprep.subr.mxu0 %v330_v6  ;;  %2636 = vmatprep.subr.mxu1 %v330_v6  ;;  %v316_v35 = vld [vmem:[%s3526_s29 + $0x78] sm:$0xff]  ;;  %640 = vst.msk [vmem:[#allocation2 + $0x58] sm:$0xff] %vm627_vm0, %v3330_v36  ;;  %641 = vst.msk [vmem:[#allocation2 + $0x78] sm:$0xff] %vm627_vm0, %v3330_v36  ;;  %v370_v39 = vld [vmem:[%s4701_s3 + $0x108] sm:$0xff] }
  0x44   : > { %2581 = vmatpush3.msra.mxu0 %v330_v6  ;;  %2637 = vmatpush3.msra.mxu1 %v330_v6  ;;  %642 = vst.msk [vmem:[#allocation2 + $0x98] sm:$0xff] %vm627_vm0, %v3330_v36  ;;  %643 = vst.msk [vmem:[#allocation2 + $0xb8] sm:$0xff] %vm627_vm0, %v3330_v36  ;;  %v369_v40 = vld [vmem:[%s4701_s3 + $0x100] sm:$0xff]  ;;  %v368_v4 = vld [vmem:[%s4701_s3 + $0xf8] sm:$0xff]  ;;  %p3231_p4 = pnand %p3230_p2, %p3432_p9 }
  0x45   : > { %2582 = vmatprep.subr.mxu0 %v329_v7  ;;  %2638 = vmatprep.subr.mxu1 %v329_v7  ;;  %644 = vst.msk [vmem:[#allocation2 + $0xd8] sm:$0xff] %vm627_vm0, %v3330_v36  ;;  %645 = vst.msk [vmem:[#allocation2 + $0xf8] sm:$0xff] %vm627_vm0, %v3330_v36  ;;  %v3590_v61 = vld [vmem:[#allocation2 + $0x20] sm:$0xff] }
  0x46   : > { %2583 = vmatpush3.msra.mxu0 %v329_v7  ;;  %2639 = vmatpush3.msra.mxu1 %v329_v7  ;;  %646 = vst.msk [vmem:[#allocation2 + $0x118] sm:$0xff] %vm627_vm0, %v3330_v36  ;;  %647 = vst.msk [vmem:[#allocation2 + $0x138] sm:$0xff] %vm627_vm0, %v3330_v36  ;;  %p3232_p5 = pneg %p3231_p4 }
  0x47   : > { %2584 = vmatprep.subr.mxu0 %v328_v8  ;;  %2640 = vmatprep.subr.mxu1 %v328_v8 }
  0x48   : > { %2585 = vmatpush3.msra.mxu0 %v328_v8  ;;  %2641 = vmatpush3.msra.mxu1 %v328_v8  ;;  %v673_v57 = vld [vmem:[#allocation2 + $0x18] sm:$0xff] }
  0x49   : > { %2586 = vmatprep.subr.mxu0 %v327_v9  ;;  %2642 = vmatprep.subr.mxu1 %v327_v9  ;;  %v677_v54 = vld [vmem:[#allocation2 + $0x38] sm:$0xff]  ;;  %v835_v3 = vrot.slane %v673_v57, 2 }
  0x4a   : > { %2587 = vmatpush3.msra.mxu0 %v327_v9  ;;  %2643 = vmatpush3.msra.mxu1 %v327_v9  ;;  %v840_v62 = vrot.slane %v677_v54, 2  ;;  %v681_v63 = vld [vmem:[#allocation2 + $0x58] sm:$0xff] }
  0x4b   : > { %2588 = vmatprep.subr.mxu0 %v326_v10  ;;  %2644 = vmatprep.subr.mxu1 %v326_v10 }
  0x4c   : > { %2589 = vmatpush3.msra.mxu0 %v326_v10  ;;  %2645 = vmatpush3.msra.mxu1 %v326_v10 }
  0x4d   : > { %2590 = vmatprep.subr.mxu0 %v325_v11  ;;  %2646 = vmatprep.subr.mxu1 %v325_v11 }
  0x4e   : > { %2591 = vmatpush3.msra.mxu0 %v325_v11  ;;  %2647 = vmatpush3.msra.mxu1 %v325_v11 }
  0x4f   : > { %2592 = vmatprep.subr.mxu0 %v324_v12  ;;  %2648 = vmatprep.subr.mxu1 %v324_v12 }
  0x50   : > { %2593 = vmatpush3.msra.mxu0 %v324_v12  ;;  %2649 = vmatpush3.msra.mxu1 %v324_v12 }
  0x51   : > { %2594 = vmatprep.subr.mxu0 %v323_v13  ;;  %2650 = vmatprep.subr.mxu1 %v323_v13 }
  0x52   : > { %2595 = vmatpush3.msra.mxu0 %v323_v13  ;;  %2651 = vmatpush3.msra.mxu1 %v323_v13 }
  0x53   : > { %2596 = vmatprep.subr.mxu0 %v322_v14  ;;  %2652 = vmatprep.subr.mxu1 %v322_v14 }
  0x54   : > { %2597 = vmatpush3.msra.mxu0 %v322_v14  ;;  %2653 = vmatpush3.msra.mxu1 %v322_v14 }
  0x55   : > { %2598 = vmatprep.subr.mxu0 %v321_v15  ;;  %2654 = vmatprep.subr.mxu1 %v321_v15 }
  0x56   : > { %2599 = vmatpush3.msra.mxu0 %v321_v15  ;;  %2600 = vmatprep.mubr.f32.mxu0 %v301_v16 }
  0x57   : > { %2655 = vmatpush3.msra.mxu1 %v321_v15  ;;  %2656 = vmatprep.mubr.f32.mxu1 %v317_v17  ;;  %v845_v15 = vrot.slane %v681_v63, 2 }
  0x58   : > { %2601 = vmatmul.mubr.f32.vlgmr.msra.gmra.mxu0 %v302_v18  ;;  %2657 = vmatmul.mubr.f32.vlgmr.msra.gmra.mxu1 %v318_v19 }
  0x59   : > { %2603 = vmatprep.mubr.f32.mxu0 %v303_v20  ;;  %2659 = vmatprep.mubr.f32.mxu1 %v319_v21 }
  0x5a   : > { %2662 = vmatprep.subr.mxu1 %v372_v37  ;;  %2448 = vmatprep.subr.mxu0 %v368_v4  ;;  %v689_v4 = vld [vmem:[#allocation2 + $0x98] sm:$0xff] }
  0x5b   : > { %2663 = vmatpush3.msra.mxu1 %v372_v37 }
  0x5c   : > { %2604 = vmatmul.mubr.f32.gmra.mxu0 %v304_v22  ;;  %2660 = vmatmul.mubr.f32.gmra.mxu1 %v320_v23  ;;  %v352_v22 = vld [vmem:[%s4701_s3 + $0x78] sm:$0xff]  ;;  %v367_v23 = vld [vmem:[%s4701_s3 + $0xf0] sm:$0xff] }
  0x5d   : > { %2606 = vmatprep.mubr.f32.mxu0 %v305_v24  ;;  %2664 = vmatprep.subr.mxu1 %v371_v38 }
  0x5e   : > { %2665 = vmatpush3.msra.mxu1 %v371_v38  ;;  %2449 = vmatpush3.msra.mxu0 %v352_v22  ;;  %v855_v22 = vrot.slane %v689_v4, 2 }
  0x5f   : > { %2666 = vmatprep.subr.mxu1 %v370_v39  ;;  %2450 = vmatprep.subr.mxu0 %v367_v23  ;;  %v346_v23 = vld [vmem:[%s4701_s3 + $0x48] sm:$0xff] }
  0x60   : > { %2607 = vmatmul.mubr.f32.gmra.mxu0 %v306_v25  ;;  %2667 = vmatpush3.msra.mxu1 %v370_v39 }
  0x61   : > { %2609 = vmatprep.mubr.f32.mxu0 %v307_v26  ;;  %2668 = vmatprep.subr.mxu1 %v369_v40 }
  0x62   : > { %2669 = vmatpush3.msra.mxu1 %v369_v40  ;;  %v685_v40 = vld [vmem:[#allocation2 + $0x78] sm:$0xff] }
  0x63   : > { %v850_v54 = vrot.slane %v685_v40, 2  ;;  %v693_v40 = vld [vmem:[#allocation2 + $0xb8] sm:$0xff] }
  0x64   : > { %2610 = vmatmul.mubr.f32.gmra.mxu0 %v308_v27  ;;  %v351_v27 = vld [vmem:[%s4701_s3 + $0x70] sm:$0xff] }
  0x65   : > { %2612 = vmatprep.mubr.f32.mxu0 %v309_v28  ;;  %2451 = vmatpush3.msra.mxu0 %v351_v27 }
  0x68   : > { %2613 = vmatmul.mubr.f32.gmra.mxu0 %v310_v29 }
  0x69   : > { %2615 = vmatprep.mubr.f32.mxu0 %v311_v30 }
  0x6c   : > { %2616 = vmatmul.mubr.f32.gmra.mxu0 %v312_v31  ;;  %v366_v31 = vld [vmem:[%s4701_s3 + $0xe8] sm:$0xff] }
  0x6d   : > { %2618 = vmatprep.mubr.f32.mxu0 %v313_v32  ;;  %2452 = vmatprep.subr.mxu0 %v366_v31  ;;  %v361_v31 = vld [vmem:[%s4701_s3 + $0xc0] sm:$0xff] }
  0x70   : > { %2619 = vmatmul.mubr.f32.gmra.mxu0 %v314_v33 }
  0x71   : > { %2621 = vmatprep.mubr.f32.mxu0 %v315_v34  ;;  %v350_v34 = vld [vmem:[%s4701_s3 + $0x68] sm:$0xff] }
  0x72   : > { %2453 = vmatpush3.msra.mxu0 %v350_v34 }
  0x74   : > { %2622 = vmatmul.mubr.f32.gmra.mxu0 %v316_v35  ;;  %v365_v35 = vld [vmem:[%s4701_s3 + $0xe0] sm:$0xff] }
  0x75   : > { %2454 = vmatprep.subr.mxu0 %v365_v35 }
 0x118   : > { %v2602_v41 = vpop.f32.mrf.mxu0  ;;  %v2658_v42 = vpop.f32.mrf.mxu1 }
 0x119   : > { %v523_v43 = vmax.f32 %v2602_v41, 0.0  ;;  %v624_v44 = vmax.f32 %v2658_v42, 0.0  ;;  %v349_v42 = vld [vmem:[%s4701_s3 + $0x60] sm:$0xff] }
 0x11a   : > { %v443_v45 = vpop.f32.mrf.mxu0  ;;  %v604_v46 = vpop.f32.mrf.mxu1  ;;  %2455 = vmatpush3.msra.mxu0 %v349_v42 }
 0x11b   : > { %652 = vst.msk [vmem:[#allocation2 + $0x30] sm:$0xff] %vm627_vm0, %v523_v43  ;;  %649 = vst.msk [vmem:[#allocation2 + $0x10] sm:$0xff] %vm627_vm0, %v624_v44  ;;  %v522_v47 = vmax.f32 %v443_v45, 0.0  ;;  %v623_v48 = vmax.f32 %v604_v46, 0.0 }
 0x11c   : > { %v2605_v49 = vpop.f32.mrf.mxu0  ;;  %v2661_v50 = vpop.f32.mrf.mxu1 }
 0x11d   : > { %651 = vst.msk [vmem:[#allocation2 + $0x28] sm:$0xff] %vm627_vm0, %v522_v47  ;;  %648 = vst.msk [vmem:[#allocation2 + $0x8] sm:$0xff] %vm627_vm0, %v623_v48  ;;  %v525_v51 = vmax.f32 %v2605_v49, 0.0  ;;  %v626_v52 = vmax.f32 %v2661_v50, 0.0 }
 0x11e   : > { %v453_v53 = vpop.f32.mrf.mxu0  ;;  %v614_v55 = vpop.f32.mrf.mxu1 }
 0x11f   : > { %654 = vst.msk [vmem:[#allocation2 + $0x50] sm:$0xff] %vm627_vm0, %v525_v51  ;;  %v524_v56 = vmax.f32 %v453_v53, 0.0  ;;  %669 = vst.msk [vmem:[#allocation2 + $0x130] sm:$0xff] %vm627_vm0, %v626_v52  ;;  %v625_v58 = vmax.f32 %v614_v55, 0.0  ;;  %v364_v51 = vld [vmem:[%s4701_s3 + $0xd8] sm:$0xff] }
 0x120   : > { %v2608_v59 = vpop.f32.mrf.mxu0  ;;  %2456 = vmatprep.subr.mxu0 %v364_v51 }
 0x121   : > { %653 = vst.msk [vmem:[#allocation2 + $0x48] sm:$0xff] %vm627_vm0, %v524_v56  ;;  %v527_v60 = vmax.f32 %v2608_v59, 0.0  ;;  %668 = vst.msk [vmem:[#allocation2 + $0x128] sm:$0xff] %vm627_vm0, %v625_v58  ;;  %v3686_v58 = vld [vmem:[#allocation2 + $0x40] sm:$0xff] }
 0x122   : > { %v463_v0 = vpop.f32.mrf.mxu0  ;;  %v3593_v1 = vld [vmem:[#allocation2 + $0x10] sm:$0xff] }
 0x123   : > { %v3595_v2 = vld [vmem:[#allocation2 + $0x30] sm:$0xff]  ;;  %656 = vst.msk [vmem:[#allocation2 + $0x70] sm:$0xff] %vm627_vm0, %v527_v60  ;;  %v526_v5 = vmax.f32 %v463_v0, 0.0  ;;  %v728_v6 = vrot.slane %v3593_v1, 1  ;;  %v833_v7 = vrot.slane %v3593_v1, 2 }
 0x124   : > { %v838_v8 = vrot.slane %v3595_v2, 2  ;;  %v2611_v9 = vpop.f32.mrf.mxu0  ;;  %v3604_v10 = vld [vmem:[#allocation2 + $0x28] sm:$0xff]  ;;  %v3682_v53 = vrot.slane %v3595_v2, 1 }
 0x125   : > { %v3606_v11 = vld [vmem:[#allocation2 + $0x8] sm:$0xff]  ;;  %655 = vst.msk [vmem:[#allocation2 + $0x68] sm:$0xff] %vm627_vm0, %v526_v5  ;;  %v529_v12 = vmax.f32 %v2611_v9, 0.0  ;;  %v2812_v13 = vpack.i.bf16 %v3604_v10, %v3590_v61  ;;  %v836_v18 = vsel %vm831_vm1, %v833_v7, %v835_v3  ;;  %v837_v19 = vrot.slane %v3604_v10, 2  ;;  %v363_v5 = vld [vmem:[%s4701_s3 + $0xd0] sm:$0xff] }
 0x126   : > { %v3612_v14 = vsel %vm831_vm1, %v838_v8, %v840_v62  ;;  %v3615_v17 = vld [vmem:[#allocation2 + $0x50] sm:$0xff]  ;;  %v832_v20 = vrot.slane %v3606_v11, 2  ;;  %v473_v21 = vpop.f32.mrf.mxu0  ;;  %v727_v25 = vrot.slane %v3606_v11, 1  ;;  %v3658_v39 = vrot.slane %v3604_v10, 1  ;;  %v348_v62 = vld [vmem:[%s4701_s3 + $0x58] sm:$0xff] }
 0x127   : > { %v2817_v16 = vpack.i.bf16 %v728_v6, %v3612_v14  ;;  %658 = vst.msk [vmem:[#allocation2 + $0x90] sm:$0xff] %vm627_vm0, %v529_v12  ;;  %2813 = vrot.lane.b32.xlu1 %v2812_v13, %s3331_s26  ;;  %v843_v24 = vrot.slane %v3615_v17, 2  ;;  %v528_v26 = vmax.f32 %v473_v21, 0.0  ;;  %v839_v28 = vsel %vm831_vm1, %v837_v19, %v838_v8  ;;  %v347_v9 = vld [vmem:[%s4701_s3 + $0x50] sm:$0xff]  ;;  %2457 = vmatpush3.msra.mxu0 %v348_v62 }
 0x128   : > { %v3635_v29 = vld [vmem:[#allocation2 + $0x48] sm:$0xff]  ;;  %v2614_v30 = vpop.f32.mrf.mxu0  ;;  %v2822_v32 = vpack.i.bf16 %v836_v18, %v3615_v17  ;;  %v3651_v36 = vpack.i.bf16 %v839_v28, %v837_v19  ;;  %v834_v37 = vsel %vm831_vm1, %v832_v20, %v833_v7  ;;  %v729_v45 = vsel %vm726_vm2, %v727_v25, %v728_v6  ;;  %2458 = vmatprep.subr.mxu0 %v363_v5  ;;  %v343_v5 = vld [vmem:[%s4701_s3 + $0x30] sm:$0xff] }
 0x129   : > { %2818 = vrot.lane.b32.xlu0 %v2817_v16, %s3332_s7  ;;  %v3642_v33 = vrot.slane %v3635_v29, 2  ;;  %657 = vst.msk [vmem:[#allocation2 + $0x88] sm:$0xff] %vm627_vm0, %v528_v26  ;;  %v3655_v38 = vsel %vm831_vm1, %v843_v24, %v845_v15  ;;  %v531_v49 = vmax.f32 %v2614_v30, 0.0  ;;  %v2837_v52 = vpack.i.bf16 %v834_v37, %v832_v20  ;;  %v362_v18 = vld [vmem:[%s4701_s3 + $0xc8] sm:$0xff]  ;;  %2459 = vmatpush3.msra.mxu0 %v347_v9 }
 0x12a   : > { %v483_v41 = vpop.f32.mrf.mxu0  ;;  %v1495_v46 = vrot.slane %v3655_v38, 7  ;;  %v3671_v47 = vld [vmem:[#allocation2 + $0x70] sm:$0xff]  ;;  %v2832_v56 = vpack.i.bf16 %v729_v45, %v727_v25  ;;  %v3700_v63 = vsel %vm726_vm2, %v3658_v39, %v3682_v53  ;;  %v3716_v12 = vpack.i.bf16 %v3635_v29, %v3686_v58  ;;  %2460 = vmatprep.subr.mxu0 %v362_v18 }
 0x12b   : > { %2823 = vrot.lane.b32.xlu1 %v2822_v32, %s3333_s23  ;;  %v3666_v43 = vsel %vm831_vm1, %v3642_v33, %v843_v24  ;;  %v1488_v44 = vrot.slane %v3642_v33, 7  ;;  %660 = vst.msk [vmem:[#allocation2 + $0xb0] sm:$0xff] %vm627_vm0, %v531_v49  ;;  %v848_v0 = vrot.slane %v3671_v47, 2  ;;  %v530_v3 = vmax.f32 %v483_v41, 0.0  ;;  %2461 = vmatpush3.msra.mxu0 %v346_v23  ;;  %v345_v41 = vld [vmem:[%s4701_s3 + $0x40] sm:$0xff] }
 0x12c   : > { %v1489_v48 = vrot.slane %v3666_v43, 7  ;;  %v3676_v50 = vld [vmem:[#allocation2 + $0x68] sm:$0xff]  ;;  %v2617_v60 = vpop.f32.mrf.mxu0  ;;  %v2842_v19 = vpack.i.bf16 %v3700_v63, %v3658_v39  ;;  %v2867_v32 = vpack.i.bf16 %v3682_v53, %v3655_v38  ;;  %v3754_v34 = vrot.slane %v3615_v17, 1  ;;  %2462 = vmatprep.subr.mxu0 %v361_v31 }
 0x12d   : > { %2828 = vrot.lane.b32.xlu0 %v3651_v36, %s3332_s7  ;;  %v3690_v59 = vrot.slane %v3676_v50, 2  ;;  %v3723_v15 = vsel %vm831_vm1, %v848_v0, %v850_v54  ;;  %659 = vst.msk [vmem:[#allocation2 + $0xa8] sm:$0xff] %vm627_vm0, %v530_v3  ;;  %v533_v16 = vmax.f32 %v2617_v60, 0.0  ;;  %v3762_v42 = vrot.slane %v3635_v29, 1  ;;  %2463 = vmatpush3.msra.mxu0 %v345_v41  ;;  %v356_v41 = vld [vmem:[%s4701_s3 + $0x98] sm:$0xff] }
 0x12e   : > { %v1490_v55 = vsel %vm1481_vm3, %v1488_v44, %v1489_v48  ;;  %v1496_v57 = vsel %vm1481_vm3, %v1489_v48, %v1495_v46  ;;  %v493_v8 = vpop.f32.mrf.mxu0  ;;  %v1510_v21 = vrot.slane %v3723_v15, 7  ;;  %v3739_v24 = vld [vmem:[#allocation2 + $0x90] sm:$0xff]  ;;  %v360_v48 = vld [vmem:[%s4701_s3 + $0xb8] sm:$0xff] }
 0x12f   : > { %2838 = vrot.lane.b32.xlu1 %v2837_v52, %s3333_s23  ;;  %2670 = vmatprep.mubr.msk.f32.mxu1 %vm627_vm0, %v1490_v55  ;;  %v1503_v6 = vrot.slane %v3690_v59, 7  ;;  %v3720_v13 = vsel %vm831_vm1, %v3690_v59, %v848_v0  ;;  %662 = vst.msk [vmem:[#allocation2 + $0xd0] sm:$0xff] %vm627_vm0, %v533_v16  ;;  %v853_v28 = vrot.slane %v3739_v24, 2  ;;  %v532_v37 = vmax.f32 %v493_v8, 0.0  ;;  %v344_v52 = vld [vmem:[%s4701_s3 + $0x38] sm:$0xff]  ;;  %v358_v8 = vld [vmem:[%s4701_s3 + $0xa8] sm:$0xff] }
 0x130   : > { %2671 = vmatmul.mubr.msk.f32.vlgmr.msra.gmra.mxu1 %vm627_vm0, %v1496_v57  ;;  %v3709_v7 = vld [vmem:[#allocation2 + $0x88] sm:$0xff]  ;;  %v1504_v20 = vrot.slane %v3720_v13, 7  ;;  %v2620_v30 = vpop.f32.mrf.mxu0  ;;  %v860_v55 = vrot.slane %v693_v40, 2  ;;  %2464 = vmatprep.subr.mxu0 %v360_v48  ;;  %v2857_v0 = vpack.i.bf16 %v3595_v2, %v3754_v34 }
 0x131   : > { %2833 = vrot.lane.b32.xlu0 %v2832_v56, %s3332_s7  ;;  %v3742_v25 = vrot.slane %v3709_v7, 2  ;;  %v3770_v45 = vsel %vm831_vm1, %v853_v28, %v855_v22  ;;  %661 = vst.msk [vmem:[#allocation2 + $0xc8] sm:$0xff] %vm627_vm0, %v532_v37  ;;  %v535_v51 = vmax.f32 %v2620_v30, 0.0  ;;  %v2882_v56 = vpack.i.bf16 %v3666_v43, %v3642_v33  ;;  %2465 = vmatpush3.msra.mxu0 %v344_v52  ;;  %v341_v37 = vld [vmem:[%s4701_s3 + $0x20] sm:$0xff] }
 0x132   : > { %v1505_v26 = vsel %vm1481_vm3, %v1503_v6, %v1504_v20  ;;  %v1511_v27 = vsel %vm1481_vm3, %v1504_v20, %v1510_v21  ;;  %v503_v46 = vpop.f32.mrf.mxu0  ;;  %v1525_v29 = vrot.slane %v3770_v45, 7  ;;  %v3791_v62 = vld [vmem:[#allocation2 + $0xb0] sm:$0xff]  ;;  %v3801_v33 = vsel %vm726_vm2, %v3762_v42, %v3754_v34  ;;  %v697_v6 = vld [vmem:[#allocation2 + $0xd8] sm:$0xff] }
 0x133   : > { %2853 = vrot.lane.b32.xlu1 %v3716_v12, %s3333_s23  ;;  %2673 = vmatprep.mubr.msk.f32.mxu1 %vm627_vm0, %v1505_v26  ;;  %v1518_v35 = vrot.slane %v3742_v25, 7  ;;  %v3767_v44 = vsel %vm831_vm1, %v3742_v25, %v853_v28  ;;  %664 = vst.msk [vmem:[#allocation2 + $0xf0] sm:$0xff] %vm627_vm0, %v535_v51  ;;  %v858_v3 = vrot.slane %v3791_v62, 2  ;;  %v534_v2 = vmax.f32 %v503_v46, 0.0  ;;  %v357_v28 = vld [vmem:[%s4701_s3 + $0xa0] sm:$0xff] }
 0x134   : > { %2674 = vmatmul.mubr.msk.f32.gmra.mxu1 %vm627_vm0, %v1511_v27  ;;  %v1519_v49 = vrot.slane %v3767_v44, 7  ;;  %v3784_v54 = vld [vmem:[#allocation2 + $0xa8] sm:$0xff]  ;;  %v2623_v4 = vpop.f32.mrf.mxu0  ;;  %v2887_v20 = vpack.i.bf16 %v3801_v33, %v3762_v42  ;;  %v865_v27 = vrot.slane %v697_v6, 2  ;;  %v3855_v46 = vld [vmem:[#allocation2 + $0x60] sm:$0xff] }
 0x135   : > { %2843 = vrot.lane.b32.xlu0 %v2842_v19, %s3332_s7  ;;  %v3805_v43 = vrot.slane %v3784_v54, 2  ;;  %v3823_v18 = vsel %vm831_vm1, %v858_v3, %v860_v55  ;;  %v342_v19 = vld [vmem:[%s4701_s3 + $0x28] sm:$0xff]  ;;  %663 = vst.msk [vmem:[#allocation2 + $0xe8] sm:$0xff] %vm627_vm0, %v534_v2  ;;  %v537_v23 = vmax.f32 %v2623_v4, 0.0  ;;  %v340_v55 = vld [vmem:[%s4701_s3 + $0x18] sm:$0xff] }
 0x136   : > { %v1520_v57 = vsel %vm1481_vm3, %v1518_v35, %v1519_v49  ;;  %v1526_v60 = vsel %vm1481_vm3, %v1519_v49, %v1525_v29  ;;  %v1540_v22 = vrot.slane %v3823_v18, 7  ;;  %v701_v49 = vld [vmem:[#allocation2 + $0xf8] sm:$0xff]  ;;  %v2872_v29 = vpack.i.bf16 %v3612_v14, %v3671_v47  ;;  %v513_v52 = vpop.f32.mrf.mxu0  ;;  %v355_v14 = vld [vmem:[%s4701_s3 + $0x90] sm:$0xff] }
 0x137   : > { %2868 = vrot.lane.b32.xlu1 %v2867_v32, %s3332_s7  ;;  %2676 = vmatprep.mubr.msk.f32.mxu1 %vm627_vm0, %v1520_v57  ;;  %v3819_v9 = vsel %vm831_vm1, %v3805_v43, %v858_v3  ;;  %v1533_v16 = vrot.slane %v3805_v43, 7  ;;  %666 = vst.msk [vmem:[#allocation2 + $0x110] sm:$0xff] %vm627_vm0, %v537_v23  ;;  %v3842_v32 = vld [vmem:[#allocation2 + $0xd0] sm:$0xff]  ;;  %v870_v4 = vrot.slane %v701_v49, 2  ;;  %v354_v23 = vld [vmem:[%s4701_s3 + $0x88] sm:$0xff] }
 0x138   : > { %2677 = vmatmul.mubr.msk.f32.gmra.mxu1 %vm627_vm0, %v1526_v60  ;;  %v1534_v21 = vrot.slane %v3819_v9, 7  ;;  %v3833_v26 = vld [vmem:[#allocation2 + $0xc8] sm:$0xff]  ;;  %v863_v40 = vrot.slane %v3842_v32, 2 }
 0x139   : > { %2848 = vrot.lane.b32.xlu0 %v3651_v36, %s3333_s23  ;;  %v359_v36 = vld [vmem:[%s4701_s3 + $0xb0] sm:$0xff]  ;;  %v862_v35 = vrot.slane %v3833_v26, 2  ;;  %v3913_v49 = vld [vmem:[#allocation2 + $0x128] sm:$0xff] }
 0x13a   : > { %2466 = vmatprep.subr.mxu0 %v359_v36  ;;  %v1535_v30 = vsel %vm1481_vm3, %v1533_v16, %v1534_v21  ;;  %v1541_v31 = vsel %vm1481_vm3, %v1534_v21, %v1540_v22  ;;  %v3862_v51 = vsel %vm831_vm1, %v863_v40, %v865_v27  ;;  %v2897_v36 = vpack.i.bf16 %v3676_v50, %v3855_v46  ;;  %v3884_v6 = vld [vmem:[#allocation2 + $0xf0] sm:$0xff] }
 0x13b   : > { %2883 = vrot.lane.b32.xlu1 %v2882_v56, %s3332_s7  ;;  %2467 = vmatpush3.msra.mxu0 %v343_v5  ;;  %v1548_v48 = vrot.slane %v862_v35, 7  ;;  %v1555_v60 = vrot.slane %v3862_v51, 7  ;;  %v339_v16 = vld [vmem:[%s4701_s3 + $0x10] sm:$0xff]  ;;  %v868_v21 = vrot.slane %v3884_v6, 2 }
 0x13c   : > { %2468 = vmatprep.subr.mxu0 %v358_v8  ;;  %2679 = vmatprep.mubr.msk.f32.mxu1 %vm627_vm0, %v1535_v30  ;;  %v3877_v3 = vld [vmem:[#allocation2 + $0xe8] sm:$0xff]  ;;  %v536_v8 = vmax.f32 %v513_v52, 0.0 }
 0x13d   : > { %2858 = vrot.lane.b32.xlu0 %v2857_v0, %s3331_s26  ;;  %2469 = vmatpush3.msra.mxu0 %v342_v19  ;;  %v867_v19 = vrot.slane %v3877_v3, 2  ;;  %v338_v30 = vld [vmem:[%s4701_s3 + $0x8] sm:$0xff] }
 0x13e   : > { %2680 = vmatmul.mubr.msk.f32.gmra.mxu1 %vm627_vm0, %v1541_v31  ;;  %2470 = vmatprep.subr.mxu0 %v357_v28  ;;  %v3892_v22 = vld [vmem:[#allocation2 + $0x110] sm:$0xff]  ;;  %665 = vst.msk [vmem:[#allocation2 + $0x108] sm:$0xff] %vm627_vm0, %v536_v8  ;;  %v705_v28 = vld [vmem:[#allocation2 + $0x118] sm:$0xff] }
 0x13f   : > { %2888 = vrot.lane.b32.xlu1 %v2887_v20, %s3332_s7  ;;  %2471 = vmatpush3.msra.mxu0 %v341_v37  ;;  %v3097_v27 = vpack.i.bf16 %v3862_v51, %v3892_v22  ;;  %v869_v31 = vsel %vm831_vm1, %v867_v19, %v868_v21  ;;  %v3908_v37 = vsel %vm831_vm1, %v868_v21, %v870_v4  ;;  %v1055_v52 = vrot.slane %v3892_v22, 2  ;;  %v3929_v4 = vld [vmem:[#allocation2 + $0x130] sm:$0xff] }
 0x140   : > { %2472 = vmatprep.subr.mxu0 %v356_v41  ;;  %v1564_v41 = vrot.slane %v869_v31, 7  ;;  %v1283_v8 = vrot.slane %v3929_v4, 2 }
 0x141   : > { %2863 = vrot.lane.b32.xlu0 %v3716_v12, %s3331_s26  ;;  %v864_v12 = vsel %vm831_vm1, %v862_v35, %v863_v40  ;;  %2473 = vmatpush3.msra.mxu0 %v340_v55  ;;  %v1057_v55 = vrot.slane %v705_v28, 2 }
 0x142   : > { %v1549_v57 = vrot.slane %v864_v12, 7  ;;  %v3875_v0 = vpack.i.bf16 %v864_v12, %v862_v35  ;;  %2474 = vmatprep.subr.mxu0 %v355_v14  ;;  %v1563_v35 = vrot.slane %v867_v19, 7  ;;  %v3917_v12 = vpack.i.bf16 %v869_v31, %v867_v19 }
 0x143   : > { %2893 = vrot.lane.b32.xlu1 %v2882_v56, %s3333_s23  ;;  %v3880_v56 = vrot.slane %v3671_v47, 1  ;;  %2475 = vmatpush3.msra.mxu0 %v339_v16  ;;  %v1206_v16 = vrot.slane %v3913_v49, 1  ;;  %v2927_v19 = vpack.i.bf16 %v3720_v13, %v3690_v59 }
 0x144   : > { %v1550_v5 = vsel %vm1481_vm3, %v1548_v48, %v1549_v57  ;;  %v1556_v2 = vsel %vm1481_vm3, %v1549_v57, %v1555_v60  ;;  %v1570_v48 = vrot.slane %v3908_v37, 7  ;;  %2476 = vmatprep.subr.mxu0 %v354_v23  ;;  %v3925_v57 = vrot.slane %v3676_v50, 1 }
 0x145   : > { %2873 = vrot.lane.b32.xlu0 %v2872_v29, %s3333_s23  ;;  %2682 = vmatprep.mubr.msk.f32.mxu1 %vm627_vm0, %v1550_v5  ;;  %v2902_v40 = vpack.i.bf16 %v3615_v17, %v3880_v56  ;;  %v709_v29 = vld [vmem:[#allocation2 + $0x138] sm:$0xff]  ;;  %v353_v17 = vld [vmem:[%s4701_s3 + $0x80] sm:$0xff]  ;;  %v1565_v60 = vsel %vm1481_vm3, %v1563_v35, %v1564_v41  ;;  %v3942_v21 = vld [vmem:[#allocation2 + $0x108] sm:$0xff]  ;;  %v3945_v23 = vsel %vm831_vm1, %v1055_v52, %v1057_v55 }
 0x146   : > { %2683 = vmatmul.mubr.msk.f32.gmra.mxu1 %vm627_vm0, %v1556_v2  ;;  %2477 = vmatpush3.msra.mxu0 %v338_v30  ;;  %v1571_v14 = vsel %vm1481_vm3, %v1564_v41, %v1570_v48  ;;  %v337_v5 = vld [vmem:[%s4701_s3] sm:$0xff]  ;;  %v1282_v2 = vrot.slane %v3913_v49, 2  ;;  %v1285_v50 = vrot.slane %v709_v29, 2  ;;  %v1207_v30 = vrot.slane %v3929_v4, 1 }
 0x147   : > { %2898 = vrot.lane.b32.xlu1 %v2897_v36, %s3333_s23  ;;  %2685 = vmatprep.mubr.msk.f32.mxu1 %vm627_vm0, %v1565_v60  ;;  %v3953_v31 = vsel %vm726_vm2, %v3925_v57, %v3880_v56  ;;  %v3956_v35 = vrot.slane %v3942_v21, 2  ;;  %v1585_v59 = vrot.slane %v3945_v23, 7 }
 0x148   : > { %2478 = vmatprep.subr.mxu0 %v353_v17  ;;  %v1284_v28 = vsel %vm831_vm1, %v1282_v2, %v1283_v8  ;;  %v1593_v13 = vrot.slane %v1282_v2, 7  ;;  %v1286_v41 = vsel %vm831_vm1, %v1283_v8, %v1285_v50  ;;  %v1208_v48 = vsel %vm726_vm2, %v1206_v16, %v1207_v30 }
 0x149   : > { %2878 = vrot.lane.b32.xlu0 %v2887_v20, %s3331_s26  ;;  %v2912_v20 = vpack.i.bf16 %v3754_v34, %v3723_v15  ;;  %2479 = vmatpush3.msra.mxu0 %v337_v5  ;;  %v3966_v29 = vsel %vm831_vm1, %v3956_v35, %v1055_v52  ;;  %v2932_v55 = vpack.i.bf16 %v3953_v31, %v3925_v57  ;;  %v1600_v5 = vrot.slane %v1286_v41, 7 }
 0x14a   : > { %2686 = vmatmul.mubr.msk.f32.gmra.mxu1 %vm627_vm0, %v1571_v14  ;;  %v1579_v17 = vrot.slane %v3966_v29, 7  ;;  %v3972_v60 = vpack.i.bf16 %v1208_v48, %v1206_v16  ;;  %v3152_v14 = vpack.i.bf16 %v3966_v29, %v3956_v35  ;;  %v3162_v52 = vpack.i.bf16 %v3908_v37, %v3929_v4  ;;  %v3989_v16 = vld [vmem:[#allocation2 + $0x80] sm:$0xff] }
 0x14b   : > { %2903 = vrot.lane.b32.xlu1 %v2902_v40, %s3331_s26  ;;  %v1594_v40 = vrot.slane %v1284_v28, 7  ;;  %v4002_v41 = vrot.slane %v3709_v7, 1 }
 0x14c   : > { %v1586_v8 = vsel %vm1481_vm3, %v1579_v17, %v1585_v59  ;;  %v2942_v59 = vpack.i.bf16 %v3709_v7, %v3989_v16 }
 0x14d   : > { %2913 = vrot.lane.b32.xlu0 %v2912_v20, %s3332_s7  ;;  %v1578_v20 = vrot.slane %v3956_v35, 7  ;;  %v1595_v50 = vsel %vm1481_vm3, %v1593_v13, %v1594_v40  ;;  %v1601_v28 = vsel %vm1481_vm3, %v1594_v40, %v1600_v5  ;;  %v3999_v13 = vrot.slane %v3739_v24, 1 }
 0x14f   : > { %2908 = vrot.lane.b32.xlu1 %v2897_v36, %s3331_s26  ;;  %v2917_v36 = vpack.i.bf16 %v3655_v38, %v3739_v24  ;;  %v3978_v38 = vpack.i.bf16 %v3892_v22, %v1207_v30  ;;  %v1580_v2 = vsel %vm1481_vm3, %v1578_v20, %v1579_v17  ;;  %v2957_v30 = vpack.i.bf16 %v3880_v56, %v3770_v45 }
 0x150   : > { %2688 = vmatprep.mubr.msk.f32.mxu1 %vm627_vm0, %v1580_v2  ;;  %v2947_v40 = vpack.i.bf16 %v3671_v47, %v3999_v13  ;;  %v4014_v48 = vsel %vm726_vm2, %v4002_v41, %v3999_v13  ;;  %v4024_v47 = vld [vmem:[#allocation2 + $0xa0] sm:$0xff]  ;;  %v3017_v17 = vpack.i.bf16 %v3819_v9, %v3805_v43 }
 0x151   : > { %2928 = vrot.lane.b32.xlu0 %v2927_v19, %s3332_s7  ;;  %2689 = vmatmul.mubr.msk.f32.gmra.mxu1 %vm627_vm0, %v1586_v8  ;;  %v2977_v7 = vpack.i.bf16 %v4014_v48, %v4002_v41  ;;  %v4060_v43 = vld [vmem:[#allocation2 + $0xc0] sm:$0xff]  ;;  %v4071_v8 = vrot.slane %v3833_v26, 1 }
 0x152   : > { %2691 = vmatprep.mubr.msk.f32.mxu1 %vm627_vm0, %v1595_v50  ;;  %v3032_v2 = vpack.i.bf16 %v3833_v26, %v4060_v43 }
 0x153   : > { %2918 = vrot.lane.b32.xlu1 %v2917_v36, %s3333_s23  ;;  %v4031_v36 = vrot.slane %v3791_v62, 1 }
 0x155   : > { %2933 = vrot.lane.b32.xlu0 %v2932_v55, %s3332_s7  ;;  %2692 = vmatmul.mubr.msk.f32.gmra.mxu1 %vm627_vm0, %v1601_v28  ;;  %v2992_v20 = vpack.i.bf16 %v3739_v24, %v4031_v36  ;;  %v3007_v24 = vpack.i.bf16 %v3770_v45, %v3842_v32  ;;  %v3047_v9 = vpack.i.bf16 %v4031_v36, %v3862_v51  ;;  %v4068_v45 = vrot.slane %v3842_v32, 1 }
 0x156   : > { %v4142_v51 = vrot.slane %v3942_v21, 1 }
 0x157   : > { %2923 = vrot.lane.b32.xlu1 %v2932_v55, %s3331_s26  ;;  %v4041_v55 = vrot.slane %v3784_v54, 1  ;;  %v3037_v50 = vpack.i.bf16 %v3791_v62, %v4068_v45  ;;  %v4080_v28 = vsel %vm726_vm2, %v4071_v8, %v4068_v45 }
 0x158   : > { %v3067_v26 = vpack.i.bf16 %v4080_v28, %v4071_v8 }
 0x159   : > { %2938 = vrot.lane.b32.xlu0 %v2927_v19, %s3333_s23  ;;  %v2972_v19 = vpack.i.bf16 %v3767_v44, %v3742_v25  ;;  %v2962_v25 = vpack.i.bf16 %v3723_v15, %v3791_v62  ;;  %v2987_v44 = vpack.i.bf16 %v3784_v54, %v4024_v47  ;;  %v3002_v15 = vpack.i.bf16 %v3999_v13, %v3823_v18 }
 0x15a   : > { %v4050_v5 = vsel %vm726_vm2, %v4041_v55, %v4031_v36  ;;  %v3052_v62 = vpack.i.bf16 %v3823_v18, %v3884_v6 }
 0x15b   : > { %2958 = vrot.lane.b32.xlu1 %v2957_v30, %s3332_s7  ;;  %v3022_v54 = vpack.i.bf16 %v4050_v5, %v4041_v55  ;;  %v4091_v30 = vld [vmem:[#allocation2 + $0xe0] sm:$0xff] }
 0x15c   : > { %4719 = vst [vmem:[#allocation13_spill] sm:$0xff] %v4091_v30 }
 0x15d   : > { %2943 = vrot.lane.b32.xlu0 %v2942_v59, %s3333_s23 }
 0x15f   : > { %2973 = vrot.lane.b32.xlu1 %v2972_v19, %s3332_s7 }
 0x161   : > { %2948 = vrot.lane.b32.xlu0 %v2947_v40, %s3331_s26  ;;  %v3092_v40 = vpack.i.bf16 %v4068_v45, %v3908_v37 }
 0x163   : > { %2978 = vrot.lane.b32.xlu1 %v2977_v7, %s3332_s7 }
 0x165   : > { %2953 = vrot.lane.b32.xlu0 %v2942_v59, %s3331_s26  ;;  %v3077_v59 = vpack.i.bf16 %v3877_v3, %v4091_v30 }
 0x167   : > { %2983 = vrot.lane.b32.xlu1 %v2972_v19, %s3333_s23  ;;  %v4099_v19 = vrot.slane %v3884_v6, 1 }
 0x169   : > { %2963 = vrot.lane.b32.xlu0 %v2962_v25, %s3333_s23  ;;  %v3082_v18 = vpack.i.bf16 %v3842_v32, %v4099_v19 }
 0x16b   : > { %2988 = vrot.lane.b32.xlu1 %v2987_v44, %s3333_s23 }
 0x16d   : > { %2968 = vrot.lane.b32.xlu0 %v2977_v7, %s3331_s26 }
 0x16f   : > { %2993 = vrot.lane.b32.xlu1 %v2992_v20, %s3331_s26  ;;  %v706_v20 = vld [vmem:[#allocation2 + $0x120] sm:$0xff] }
 0x171   : > { %3003 = vrot.lane.b32.xlu0 %v3002_v15, %s3332_s7 }
 0x173   : > { %2998 = vrot.lane.b32.xlu1 %v2987_v44, %s3331_s26  ;;  %v702_v44 = vld [vmem:[#allocation2 + $0x100] sm:$0xff] }
 0x175   : > { %3018 = vrot.lane.b32.xlu0 %v3017_v17, %s3332_s7 }
 0x177   : > { %3008 = vrot.lane.b32.xlu1 %v3007_v24, %s3333_s23  ;;  %v3122_v24 = vpack.i.bf16 %v3942_v21, %v702_v44 }
 0x179   : > { %3023 = vrot.lane.b32.xlu0 %v3022_v54, %s3332_s7 }
 0x17b   : > { %3013 = vrot.lane.b32.xlu1 %v3022_v54, %s3331_s26  ;;  %v4137_v54 = vrot.slane %v3892_v22, 1 }
 0x17d   : > { %3028 = vrot.lane.b32.xlu0 %v3017_v17, %s3333_s23  ;;  %4720 = vst [vmem:[#allocation14_spill] sm:$0xff] %v4137_v54  ;;  %v4151_v22 = vsel %vm726_vm2, %v4142_v51, %v4137_v54 }
 0x17e   : > { %v3132_v21 = vpack.i.bf16 %v4151_v22, %v4142_v51 }
 0x17f   : > { %3048 = vrot.lane.b32.xlu1 %v3047_v9, %s3332_s7  ;;  %v3107_v9 = vpack.i.bf16 %v3913_v49, %v706_v20 }
 0x181   : > { %3033 = vrot.lane.b32.xlu0 %v3032_v2, %s3333_s23 }
 0x183   : > { %3063 = vrot.lane.b32.xlu1 %v3875_v0, %s3332_s7 }
 0x185   : > { %3038 = vrot.lane.b32.xlu0 %v3037_v50, %s3331_s26  ;;  %v3127_v50 = vpack.i.bf16 %v3884_v6, %v4137_v54 }
 0x187   : > { %3068 = vrot.lane.b32.xlu1 %v3067_v26, %s3332_s7 }
 0x189   : > { %3043 = vrot.lane.b32.xlu0 %v3032_v2, %s3331_s26 }
 0x18b   : > { %3073 = vrot.lane.b32.xlu1 %v3875_v0, %s3333_s23  ;;  %v4109_v0 = vrot.slane %v3877_v3, 1 }
 0x18d   : > { %3053 = vrot.lane.b32.xlu0 %v3052_v62, %s3333_s23  ;;  %v4116_v7 = vsel %vm726_vm2, %v4109_v0, %v4099_v19 }
 0x18e   : > { %v3117_v3 = vpack.i.bf16 %v4116_v7, %v4109_v0 }
 0x18f   : > { %3078 = vrot.lane.b32.xlu1 %v3077_v59, %s3333_s23 }
 0x191   : > { %3058 = vrot.lane.b32.xlu0 %v3067_v26, %s3331_s26 }
 0x193   : > { %3083 = vrot.lane.b32.xlu1 %v3082_v18, %s3331_s26  ;;  %v3157_v18 = vpack.i.bf16 %v4099_v19, %v3945_v23 }
 0x195   : > { %3093 = vrot.lane.b32.xlu0 %v3092_v40, %s3332_s7 }
 0x197   : > { %3088 = vrot.lane.b32.xlu1 %v3077_v59, %s3331_s26 }
 0x199   : > { %3113 = vrot.lane.b32.xlu0 %v3917_v12, %s3332_s7  ;;  %v4120_v32 = vpop.permute.xlu1 %2813 }
 0x19b   : > { %v4122_v25 = vpop.permute.xlu0 %2818  ;;  %3098 = vrot.lane.b32.xlu1 %v3097_v27, %s3333_s23 }
 0x19d   : > { %3118 = vrot.lane.b32.xlu0 %v3117_v3, %s3332_s7  ;;  %v4131_v15 = vpop.permute.xlu1 %2823 }
 0x19f   : > { %v4133_v17 = vpop.permute.xlu0 %2828  ;;  %3103 = vrot.lane.b32.xlu1 %v3117_v3, %s3331_s26  ;;  %v670_v3 = vld [vmem:[#allocation2] sm:$0xff] }
 0x1a0   : > { %v2831_v37 = vunpack.i.h.bf16 %v4133_v17  ;;  %v2830_v4 = vunpack.i.l.bf16 %v4133_v17 }
 0x1a1   : > { %3123 = vrot.lane.b32.xlu0 %v3122_v24, %s3333_s23  ;;  %v2839_v27 = vpop.permute.xlu1 %2838 }
 0x1a3   : > { %v2834_v2 = vpop.permute.xlu0 %2833  ;;  %3108 = vrot.lane.b32.xlu1 %v3107_v9, %s3333_s23 }
 0x1a4   : > { %v2835_v40 = vunpack.i.l.bf16 %v2834_v2  ;;  %v2836_v44 = vunpack.i.h.bf16 %v2834_v2  ;;  %v2820_v2 = vunpack.i.l.bf16 %v4122_v25 }
 0x1a5   : > { %3128 = vrot.lane.b32.xlu0 %v3127_v50, %s3331_s26  ;;  %v2854_v49 = vpop.permute.xlu1 %2853  ;;  %v2826_v50 = vunpack.i.h.bf16 %v4131_v15 }
 0x1a6   : > { %v1287_v29 = vsel %vm627_vm0, %v670_v3, %v2835_v40  ;;  %v1288_v23 = vsel %vm627_vm0, %v3606_v11, %v2836_v44  ;;  %v2815_v11 = vunpack.i.l.bf16 %v4120_v32  ;;  %v2855_v40 = vunpack.i.l.bf16 %v2854_v49 }
 0x1a7   : > { %v4154_v26 = vpop.permute.xlu0 %2843  ;;  %3143 = vrot.lane.b32.xlu1 %v3972_v60, %s3331_s26  ;;  %v1363_v54 = vsel %vm627_vm0, %v3682_v53, %v2820_v2 }
 0x1a9   : > { %3133 = vrot.lane.b32.xlu0 %v3132_v21, %s3331_s26  ;;  %v4161_v6 = vpop.permute.xlu1 %2868 }
 0x1ab   : > { %v4163_v62 = vpop.permute.xlu0 %2848  ;;  %3153 = vrot.lane.b32.xlu1 %v3152_v14, %s3332_s7  ;;  %v2821_v14 = vunpack.i.h.bf16 %v4122_v25  ;;  %v2856_v25 = vunpack.i.h.bf16 %v2854_v49 }
 0x1ad   : > { %3138 = vrot.lane.b32.xlu0 %v3917_v12, %s3333_s23  ;;  %v4171_v59 = vpop.permute.xlu1 %2883  ;;  %v2840_v12 = vunpack.i.l.bf16 %v2839_v27  ;;  %v1289_v3 = vsel %vm627_vm0, %v3593_v1, %v2821_v14  ;;  %v1362_v1 = vsel %vm627_vm0, %v3700_v63, %v2831_v37 }
 0x1ae   : > { %v1314_v17 = vsel %vm1311_vm4, %v1289_v3, %v2826_v50 }
 0x1af   : > { %v2859_v60 = vpop.permute.xlu0 %2858  ;;  %3158 = vrot.lane.b32.xlu1 %v3157_v18, %s3332_s7  ;;  %v2825_v18 = vunpack.i.l.bf16 %v4131_v15  ;;  %v1361_v15 = vsel %vm627_vm0, %v3658_v39, %v2830_v4 }
 0x1b0   : > { %v2860_v44 = vunpack.i.l.bf16 %v2859_v60  ;;  %v1385_v53 = vsel %vm1311_vm4, %v1361_v15, %v2855_v40 }
 0x1b1   : > { %3148 = vrot.lane.b32.xlu0 %v3122_v24, %s3331_s26  ;;  %v4177_v20 = vpop.permute.xlu1 %2888  ;;  %v2841_v24 = vunpack.i.h.bf16 %v2839_v27  ;;  %v2816_v27 = vunpack.i.h.bf16 %v4120_v32  ;;  %v1387_v30 = vsel %vm1311_vm4, %v1363_v54, %v2825_v18  ;;  %v2846_v54 = vunpack.i.h.bf16 %v4154_v26 }
 0x1b2   : > { %v2845_v18 = vunpack.i.l.bf16 %v4154_v26 }
 0x1b3   : > { %v4179_v35 = vpop.permute.xlu0 %2863  ;;  %3168 = vrot.lane.b32.xlu1 %v3978_v38, %s3331_s26  ;;  %v1312_v38 = vsel %vm1311_vm4, %v1287_v29, %v2840_v12  ;;  %s2392_s26 = sshll.u32 %s2227_s27, 7 }
 0x1b4   : > { %v1337_v12 = vsel %vm1336_vm5, %v1312_v38, %v2815_v11  ;;  %v1386_v38 = vsel %vm1311_vm4, %v1362_v1, %v2856_v25  ;;  %v2865_v26 = vunpack.i.l.bf16 %v4179_v35  ;;  %v1290_v15 = vsel %vm627_vm0, %v3590_v61, %v2845_v18  ;;  %s4644_s7 = scalar_lea.hbm %s4703_s5, %s2392_s26 }
 0x1b5   : > { %3163 = vrot.lane.b32.xlu0 %v3162_v52, %s3333_s23  ;;  %v4191_v9 = vpop.permute.xlu1 %2893  ;;  %v1313_v52 = vsel %vm1311_vm4, %v1288_v23, %v2841_v24  ;;  %v2861_v23 = vunpack.i.h.bf16 %v2859_v60  ;;  %v1482_v2 = vrot.slane %v1337_v12, 7  ;;  %v1411_v60 = vsel %vm1336_vm5, %v1387_v30, %v2860_v44  ;;  %s2214_s23 = scalar_lea.sflag [#allocation5], %s3465_s13 }
 0x1b6   : > { %v1338_v32 = vsel %vm1336_vm5, %v1313_v52, %v2816_v27  ;;  %v1493_v40 = vrot.slane %v1411_v60, 7  ;;  %v2851_v12 = vunpack.i.h.bf16 %v4163_v62  ;;  %v2866_v1 = vunpack.i.h.bf16 %v4179_v35 }
 0x1b7   : > { %v4196_v21 = vpop.permute.xlu0 %2873  ;;  %v1483_v39 = vrot.slane %v1338_v32, 7  ;;  %v1339_v4 = vsel %vm1336_vm5, %v1314_v17, %v2861_v23  ;;  %v2850_v17 = vunpack.i.l.bf16 %v4163_v62  ;;  %v1291_v32 = vsel %vm627_vm0, %v3604_v10, %v2846_v54 }
 0x1b8   : > { %v1491_v44 = vrot.slane %v1339_v4, 7  ;;  %v2870_v62 = vunpack.i.l.bf16 %v4161_v6  ;;  %v1316_v60 = vsel %vm1311_vm4, %v1291_v32, %v2851_v12  ;;  %v2886_v10 = vunpack.i.h.bf16 %v4171_v59 }
 0x1b9   : > { %v4206_v29 = vpop.permute.xlu1 %2898  ;;  %v1484_v3 = vsel %vm1481_vm3, %v1482_v2, %v1483_v39  ;;  %v1315_v2 = vsel %vm1311_vm4, %v1290_v15, %v2850_v17  ;;  %v1341_v4 = vsel %vm1336_vm5, %v1316_v60, %v2866_v1 }
 0x1ba   : > { %v1340_v35 = vsel %vm1336_vm5, %v1315_v2, %v2865_v26 }
 0x1bb   : > { %v2879_v24 = vpop.permute.xlu0 %2878 }
 0x1bc   : > { %v2881_v49 = vunpack.i.h.bf16 %v2879_v24  ;;  %v2880_v14 = vunpack.i.l.bf16 %v2879_v24 }
 0x1bd   : > { %v2904_v52 = vpop.permute.xlu1 %2903 }
 0x1be   : > { %v1410_v50 = vsel %vm1336_vm5, %v1386_v38, %v2881_v49  ;;  %v1409_v11 = vsel %vm1336_vm5, %v1385_v53, %v2880_v14  ;;  %v2871_v49 = vunpack.i.h.bf16 %v4161_v6  ;;  %v2885_v14 = vunpack.i.l.bf16 %v4171_v59 }
 0x1bf   : > { %v4224_v63 = vpop.permute.xlu0 %2913  ;;  %v1485_v37 = vrot.slane %v1409_v11, 7  ;;  %v1486_v27 = vrot.slane %v1410_v50, 7  ;;  %v1492_v53 = vsel %vm1481_vm3, %v1483_v39, %v1491_v44  ;;  %v2875_v50 = vunpack.i.l.bf16 %v4196_v21 }
 0x1c0   : > { %v2901_v6 = vunpack.i.h.bf16 %v4206_v29  ;;  %v2900_v11 = vunpack.i.l.bf16 %v4206_v29  ;;  %v2876_v39 = vunpack.i.h.bf16 %v4196_v21  ;;  %v1366_v59 = vsel %vm627_vm0, %v3754_v34, %v2870_v62 }
 0x1c1   : > { %v1487_v25 = vsel %vm1481_vm3, %v1485_v37, %v1486_v27  ;;  %v4229_v30 = vpop.permute.xlu1 %2908  ;;  %v1494_v24 = vsel %vm1481_vm3, %v1486_v27, %v1493_v40  ;;  %v2905_v37 = vunpack.i.l.bf16 %v2904_v52  ;;  %v3172_v27 = vld [vmem:[#allocation2 + $0x30] sm:$0xff]  ;;  %v1364_v18 = vsel %vm627_vm0, %v3762_v42, %v2885_v14 }
 0x1c2   : > { %1730 = vmatprep.mubr.f32.mxu0 %v1487_v25  ;;  %v1292_v54 = vsel %vm627_vm0, %v3172_v27, %v2871_v49  ;;  %v2906_v25 = vunpack.i.h.bf16 %v2904_v52  ;;  %v1497_v21 = vrot.slane %v1340_v35, 7  ;;  %v1390_v17 = vsel %vm1311_vm4, %v1366_v59, %v2875_v50 }
 0x1c3   : > { %1731 = vmatmul.mubr.f32.vlgmr.msra.gmra.mxu0 %v1484_v3  ;;  %v4234_v23 = vpop.permute.xlu0 %2928  ;;  %v1365_v3 = vsel %vm627_vm0, %v3801_v33, %v2886_v10  ;;  %v1388_v26 = vsel %vm1311_vm4, %v1364_v18, %v2900_v11  ;;  %v1498_v34 = vrot.slane %v1341_v4, 7  ;;  %v1317_v32 = vsel %vm1311_vm4, %v1292_v54, %v2876_v39 }
 0x1c4   : > { %1735 = vmatprep.mubr.f32.mxu0 %v1494_v24  ;;  %v1389_v24 = vsel %vm1311_vm4, %v1365_v3, %v2901_v6  ;;  %v1414_v42 = vsel %vm1336_vm5, %v1390_v17, %v2905_v37  ;;  %v1342_v15 = vsel %vm1336_vm5, %v1317_v32, %v2906_v25  ;;  %v2891_v4 = vunpack.i.h.bf16 %v4177_v20  ;;  %v3173_v25 = vld [vmem:[#allocation2 + $0x48] sm:$0xff] }
 0x1c5   : > { %v4246_v38 = vpop.permute.xlu1 %2918  ;;  %v1508_v2 = vrot.slane %v1414_v42, 7  ;;  %v1499_v60 = vsel %vm1481_vm3, %v1497_v21, %v1498_v34  ;;  %v1506_v10 = vrot.slane %v1342_v15, 7  ;;  %v2890_v37 = vunpack.i.l.bf16 %v4177_v20 }
 0x1c6   : > { %v2896_v54 = vunpack.i.h.bf16 %v4191_v9  ;;  %v2895_v59 = vunpack.i.l.bf16 %v4191_v9  ;;  %v2910_v18 = vunpack.i.l.bf16 %v4229_v30  ;;  %v2911_v3 = vunpack.i.h.bf16 %v4229_v30 }
 0x1c7   : > { %1736 = vmatmul.mubr.f32.gmra.mxu0 %v1492_v53  ;;  %v4252_v61 = vpop.permute.xlu0 %2933  ;;  %v1507_v11 = vsel %vm1481_vm3, %v1498_v34, %v1506_v10  ;;  %v2916_v20 = vunpack.i.h.bf16 %v4224_v63  ;;  %v2915_v21 = vunpack.i.l.bf16 %v4224_v63  ;;  %v2930_v17 = vunpack.i.l.bf16 %v4234_v23 }
 0x1c8   : > { %v2931_v34 = vunpack.i.h.bf16 %v4234_v23  ;;  %v2920_v32 = vunpack.i.l.bf16 %v4246_v38  ;;  %v2921_v63 = vunpack.i.h.bf16 %v4246_v38 }
 0x1c9   : > { %v2924_v40 = vpop.permute.xlu1 %2923  ;;  %v1367_v23 = vsel %vm627_vm0, %v3925_v57, %v2930_v17 }
 0x1ca   : > { %v2926_v29 = vunpack.i.h.bf16 %v2924_v40  ;;  %v2925_v44 = vunpack.i.l.bf16 %v2924_v40  ;;  %v1294_v40 = vsel %vm627_vm0, %v3173_v25, %v2891_v4 }
 0x1cb   : > { %v4267_v12 = vpop.permute.xlu0 %2938 }
 0x1cc   : > { %v1413_v52 = vsel %vm1336_vm5, %v1389_v24, %v2926_v29  ;;  %v1412_v33 = vsel %vm1336_vm5, %v1388_v26, %v2925_v44  ;;  %v1293_v44 = vsel %vm627_vm0, %v3686_v58, %v2890_v37  ;;  %v1319_v26 = vsel %vm1311_vm4, %v1294_v40, %v2896_v54 }
 0x1cd   : > { %v4277_v1 = vpop.permute.xlu1 %2958  ;;  %v1500_v49 = vrot.slane %v1412_v33, 7  ;;  %v1501_v62 = vrot.slane %v1413_v52, 7  ;;  %v1318_v9 = vsel %vm1311_vm4, %v1293_v44, %v2895_v59  ;;  %v1344_v52 = vsel %vm1336_vm5, %v1319_v26, %v2911_v3 }
 0x1ce   : > { %v1343_v30 = vsel %vm1336_vm5, %v1318_v9, %v2910_v18  ;;  %v1513_v54 = vrot.slane %v1344_v52, 7  ;;  %v2936_v44 = vunpack.i.h.bf16 %v4252_v61  ;;  %v3175_v52 = vld [vmem:[#allocation2 + $0x68] sm:$0xff] }
 0x1cf   : > { %v2944_v14 = vpop.permute.xlu0 %2943  ;;  %v1502_v53 = vsel %vm1481_vm3, %v1500_v49, %v1501_v62  ;;  %v1509_v50 = vsel %vm1481_vm3, %v1501_v62, %v1508_v2  ;;  %v3174_v49 = vld [vmem:[#allocation2 + $0x50] sm:$0xff]  ;;  %v1512_v38 = vrot.slane %v1343_v30, 7  ;;  %v2941_v30 = vunpack.i.h.bf16 %v4267_v12 }
 0x1d0   : > { %1740 = vmatprep.mubr.f32.mxu0 %v1502_v53  ;;  %v2946_v42 = vunpack.i.h.bf16 %v2944_v14  ;;  %v2945_v58 = vunpack.i.l.bf16 %v2944_v14  ;;  %v1295_v62 = vsel %vm627_vm0, %v3174_v49, %v2916_v20  ;;  %v1369_v53 = vsel %vm627_vm0, %v3880_v56, %v2915_v21 }
 0x1d1   : > { %1741 = vmatmul.mubr.f32.gmra.mxu0 %v1499_v60  ;;  %v4281_v35 = vpop.permute.xlu1 %2973  ;;  %v1368_v14 = vsel %vm627_vm0, %v3953_v31, %v2931_v34  ;;  %v1320_v56 = vsel %vm1311_vm4, %v1295_v62, %v2921_v63  ;;  %v2935_v20 = vunpack.i.l.bf16 %v4252_v61  ;;  %v1514_v26 = vsel %vm1481_vm3, %v1512_v38, %v1513_v54 }
 0x1d2   : > { %1745 = vmatprep.mubr.f32.mxu0 %v1509_v50  ;;  %v1392_v4 = vsel %vm1311_vm4, %v1368_v14, %v2946_v42  ;;  %v1391_v37 = vsel %vm1311_vm4, %v1367_v23, %v2945_v58  ;;  %v1297_v63 = vsel %vm627_vm0, %v3175_v52, %v2936_v44  ;;  %v2961_v62 = vunpack.i.h.bf16 %v4277_v1 }
 0x1d3   : > { %v2949_v6 = vpop.permute.xlu0 %2948  ;;  %v1322_v14 = vsel %vm1311_vm4, %v1297_v63, %v2941_v30 }
 0x1d4   : > { %v2950_v33 = vunpack.i.l.bf16 %v2949_v6  ;;  %v2951_v2 = vunpack.i.h.bf16 %v2949_v6 }
 0x1d5   : > { %1746 = vmatmul.mubr.f32.gmra.mxu0 %v1507_v11  ;;  %v4286_v39 = vpop.permute.xlu1 %2978  ;;  %v1393_v11 = vsel %vm1311_vm4, %v1369_v53, %v2920_v32  ;;  %v2940_v32 = vunpack.i.l.bf16 %v4267_v12  ;;  %v2960_v12 = vunpack.i.l.bf16 %v4277_v1  ;;  %v2975_v53 = vunpack.i.l.bf16 %v4281_v35 }
 0x1d6   : > { %v1417_v59 = vsel %vm1336_vm5, %v1393_v11, %v2950_v33  ;;  %v1345_v31 = vsel %vm1336_vm5, %v1320_v56, %v2951_v2  ;;  %v1296_v33 = vsel %vm627_vm0, %v3855_v46, %v2935_v20 }
 0x1d7   : > { %v4289_v27 = vpop.permute.xlu0 %2953  ;;  %v1523_v17 = vrot.slane %v1417_v59, 7  ;;  %v1521_v34 = vrot.slane %v1345_v31, 7  ;;  %v1370_v59 = vsel %vm627_vm0, %v4002_v41, %v2975_v53 }
 0x1d8   : > { %v2955_v61 = vunpack.i.l.bf16 %v4289_v27  ;;  %v2956_v49 = vunpack.i.h.bf16 %v4289_v27 }
 0x1d9   : > { %v4296_v29 = vpop.permute.xlu1 %2983  ;;  %v1522_v2 = vsel %vm1481_vm3, %v1513_v54, %v1521_v34  ;;  %v3176_v54 = vld [vmem:[#allocation2 + $0x70] sm:$0xff] }
 0x1da   : > { %v1347_v11 = vsel %vm1336_vm5, %v1322_v14, %v2956_v49  ;;  %v1298_v56 = vsel %vm627_vm0, %v3176_v54, %v2961_v62 }
 0x1db   : > { %v4303_v24 = vpop.permute.xlu0 %2963 }
 0x1dd   : > { %v4312_v15 = vpop.permute.xlu1 %2988 }
 0x1de   : > { %v2991_v1 = vunpack.i.h.bf16 %v4312_v15  ;;  %v2990_v38 = vunpack.i.l.bf16 %v4312_v15 }
 0x1df   : > { %v2969_v60 = vpop.permute.xlu0 %2968 }
 0x1e0   : > { %v2971_v10 = vunpack.i.h.bf16 %v2969_v60  ;;  %v2970_v50 = vunpack.i.l.bf16 %v2969_v60  ;;  %v1321_v60 = vsel %vm1311_vm4, %v1296_v33, %v2940_v32 }
 0x1e1   : > { %v2994_v18 = vpop.permute.xlu1 %2993  ;;  %v1346_v27 = vsel %vm1336_vm5, %v1321_v60, %v2955_v61  ;;  %v2980_v60 = vunpack.i.l.bf16 %v4286_v39 }
 0x1e2   : > { %v1416_v57 = vsel %vm1336_vm5, %v1392_v4, %v2971_v10  ;;  %v1415_v6 = vsel %vm1336_vm5, %v1391_v37, %v2970_v50  ;;  %v2976_v10 = vunpack.i.h.bf16 %v4281_v35  ;;  %v2965_v50 = vunpack.i.l.bf16 %v4303_v24 }
 0x1e3   : > { %v4329_v25 = vpop.permute.xlu0 %3003  ;;  %v1515_v40 = vrot.slane %v1415_v6, 7  ;;  %v1516_v3 = vrot.slane %v1416_v57, 7  ;;  %v2966_v4 = vunpack.i.h.bf16 %v4303_v24  ;;  %v2995_v37 = vunpack.i.l.bf16 %v2994_v18 }
 0x1e4   : > { %v1372_v35 = vsel %vm627_vm0, %v3999_v13, %v2960_v12  ;;  %v2996_v57 = vunpack.i.h.bf16 %v2994_v18  ;;  %v1371_v31 = vsel %vm627_vm0, %v4014_v48, %v2976_v10  ;;  %v1527_v24 = vrot.slane %v1346_v27, 7 }
 0x1e5   : > { %v1517_v21 = vsel %vm1481_vm3, %v1515_v40, %v1516_v3  ;;  %v4334_v9 = vpop.permute.xlu1 %2998  ;;  %v1524_v58 = vsel %vm1481_vm3, %v1516_v3, %v1523_v17  ;;  %v1396_v44 = vsel %vm1311_vm4, %v1372_v35, %v2965_v50  ;;  %v1395_v20 = vsel %vm1311_vm4, %v1371_v31, %v2991_v1 }
 0x1e6   : > { %1750 = vmatprep.mubr.f32.mxu0 %v1517_v21  ;;  %v1394_v21 = vsel %vm1311_vm4, %v1370_v59, %v2990_v38  ;;  %v1528_v13 = vrot.slane %v1347_v11, 7  ;;  %v1323_v17 = vsel %vm1311_vm4, %v1298_v56, %v2966_v4  ;;  %v1420_v41 = vsel %vm1336_vm5, %v1396_v44, %v2995_v37  ;;  %v3177_v37 = vld [vmem:[#allocation2 + $0x88] sm:$0xff] }
 0x1e7   : > { %1751 = vmatmul.mubr.f32.gmra.mxu0 %v1514_v26  ;;  %v4339_v42 = vpop.permute.xlu0 %3018  ;;  %v1348_v26 = vsel %vm1336_vm5, %v1323_v17, %v2996_v57  ;;  %v1538_v52 = vrot.slane %v1420_v41, 7  ;;  %v2986_v10 = vunpack.i.h.bf16 %v4296_v29  ;;  %v2985_v27 = vunpack.i.l.bf16 %v4296_v29 }
 0x1e8   : > { %1755 = vmatprep.mubr.f32.mxu0 %v1524_v58  ;;  %v1529_v63 = vsel %vm1481_vm3, %v1527_v24, %v1528_v13  ;;  %v1536_v33 = vrot.slane %v1348_v26, 7  ;;  %v3001_v1 = vunpack.i.h.bf16 %v4334_v9  ;;  %v3000_v38 = vunpack.i.l.bf16 %v4334_v9 }
 0x1e9   : > { %v4350_v23 = vpop.permute.xlu1 %3008  ;;  %v3006_v11 = vunpack.i.h.bf16 %v4329_v25  ;;  %v3005_v4 = vunpack.i.l.bf16 %v4329_v25  ;;  %v1299_v54 = vsel %vm627_vm0, %v3989_v16, %v2980_v60  ;;  %v3021_v56 = vunpack.i.h.bf16 %v4339_v42 }
 0x1ea   : > { %v1537_v53 = vsel %vm1481_vm3, %v1528_v13, %v1536_v33  ;;  %v3020_v29 = vunpack.i.l.bf16 %v4339_v42  ;;  %v1324_v59 = vsel %vm1311_vm4, %v1299_v54, %v2985_v27  ;;  %v3011_v31 = vunpack.i.h.bf16 %v4350_v23 }
 0x1eb   : > { %1756 = vmatmul.mubr.f32.gmra.mxu0 %v1522_v2  ;;  %v4356_v46 = vpop.permute.xlu0 %3023  ;;  %v2981_v2 = vunpack.i.h.bf16 %v4286_v39  ;;  %v3010_v16 = vunpack.i.l.bf16 %v4350_v23 }
 0x1ec   : > { %v3026_v23 = vunpack.i.h.bf16 %v4356_v46 }
 0x1ed   : > { %v3014_v6 = vpop.permute.xlu1 %3013  ;;  %v1300_v39 = vsel %vm627_vm0, %v3177_v37, %v2981_v2 }
 0x1ee   : > { %v3016_v15 = vunpack.i.h.bf16 %v3014_v6  ;;  %v3015_v40 = vunpack.i.l.bf16 %v3014_v6  ;;  %v1325_v9 = vsel %vm1311_vm4, %v1300_v39, %v2986_v10  ;;  %v1349_v6 = vsel %vm1336_vm5, %v1324_v59, %v3000_v38 }
 0x1ef   : > { %v4371_v3 = vpop.permute.xlu0 %3028  ;;  %v4413_v25 = vsel %vm1336_vm5, %v1325_v9, %v3001_v1  ;;  %v1542_v26 = vrot.slane %v1349_v6, 7  ;;  %v3179_v1 = vld [vmem:[#allocation2 + $0xa8] sm:$0xff] }
 0x1f0   : > { %v1419_v18 = vsel %vm1336_vm5, %v1395_v20, %v3016_v15  ;;  %v1418_v48 = vsel %vm1336_vm5, %v1394_v21, %v3015_v40  ;;  %v3178_v15 = vld [vmem:[#allocation2 + $0x90] sm:$0xff]  ;;  %v1375_v40 = vsel %vm627_vm0, %v4031_v36, %v3005_v4  ;;  %v1373_v20 = vsel %vm627_vm0, %v4041_v55, %v3020_v29 }
 0x1f1   : > { %v4381_v34 = vpop.permute.xlu1 %3048  ;;  %v1530_v30 = vrot.slane %v1418_v48, 7  ;;  %v1531_v32 = vrot.slane %v1419_v18, 7  ;;  %v1301_v42 = vsel %vm627_vm0, %v3178_v15, %v3006_v11  ;;  %v1374_v21 = vsel %vm627_vm0, %v4050_v5, %v3021_v56 }
 0x1f2   : > { %v3025_v18 = vunpack.i.l.bf16 %v4356_v46  ;;  %v1543_v36 = vrot.slane %v4413_v25, 7  ;;  %v3031_v5 = vunpack.i.h.bf16 %v4371_v3  ;;  %v1303_v38 = vsel %vm627_vm0, %v3179_v1, %v3026_v23 }
 0x1f3   : > { %v3034_v58 = vpop.permute.xlu0 %3033  ;;  %v1532_v61 = vsel %vm1481_vm3, %v1530_v30, %v1531_v32  ;;  %v1539_v62 = vsel %vm1481_vm3, %v1531_v32, %v1538_v52  ;;  %v1326_v30 = vsel %vm1311_vm4, %v1301_v42, %v3011_v31  ;;  %v1399_v32 = vsel %vm1311_vm4, %v1375_v40, %v3010_v16  ;;  %v3180_v42 = vld [vmem:[#allocation2 + $0xb0] sm:$0xff] }
 0x1f4   : > { %1760 = vmatprep.mubr.f32.mxu0 %v1532_v61  ;;  %v3036_v24 = vunpack.i.h.bf16 %v3034_v58  ;;  %v3035_v44 = vunpack.i.l.bf16 %v3034_v58  ;;  %v3030_v61 = vunpack.i.l.bf16 %v4371_v3  ;;  %v3051_v11 = vunpack.i.h.bf16 %v4381_v34 }
 0x1f5   : > { %1761 = vmatmul.mubr.f32.gmra.mxu0 %v1529_v63  ;;  %v4385_v49 = vpop.permute.xlu1 %3063  ;;  %v3050_v4 = vunpack.i.l.bf16 %v4381_v34  ;;  %v1302_v37 = vsel %vm627_vm0, %v4024_v47, %v3025_v18  ;;  %v1328_v29 = vsel %vm1311_vm4, %v1303_v38, %v3031_v5  ;;  %v1544_v25 = vsel %vm1481_vm3, %v1542_v26, %v1543_v36  ;;  %v376_v34 = vld [vmem:[%s4702_s4 + $0x18] sm:$0xff]  ;;  %v375_v26 = vld [vmem:[%s4702_s4 + $0x10] sm:$0xff] }
 0x1f6   : > { %1765 = vmatprep.mubr.f32.mxu0 %v1539_v62  ;;  %v1398_v52 = vsel %vm1311_vm4, %v1374_v21, %v3036_v24  ;;  %v1397_v63 = vsel %vm1311_vm4, %v1373_v20, %v3035_v44  ;;  %v3066_v59 = vunpack.i.h.bf16 %v4385_v49  ;;  %v3065_v47 = vunpack.i.l.bf16 %v4385_v49  ;;  %2694 = vmatprep.subr.mxu1 %v376_v34 }
 0x1f7   : > { %v3039_v12 = vpop.permute.xlu0 %3038  ;;  %v1304_v40 = vsel %vm627_vm0, %v3180_v42, %v3051_v11  ;;  %v1378_v24 = vsel %vm627_vm0, %v4068_v45, %v3050_v4  ;;  %2695 = vmatpush3.msra.mxu1 %v376_v34 }
 0x1f8   : > { %v3041_v13 = vunpack.i.h.bf16 %v3039_v12  ;;  %v3040_v17 = vunpack.i.l.bf16 %v3039_v12  ;;  %2696 = vmatprep.subr.mxu1 %v375_v26 }
 0x1f9   : > { %1766 = vmatmul.mubr.f32.gmra.mxu0 %v1537_v53  ;;  %v4391_v14 = vpop.permute.xlu1 %3068  ;;  %2697 = vmatpush3.msra.mxu1 %v375_v26 }
 0x1fa   : > { %v1351_v46 = vsel %vm1336_vm5, %v1326_v30, %v3041_v13  ;;  %v1423_v33 = vsel %vm1336_vm5, %v1399_v32, %v3040_v17  ;;  %v3070_v44 = vunpack.i.l.bf16 %v4391_v14  ;;  %v3071_v49 = vunpack.i.h.bf16 %v4391_v14  ;;  %v374_v14 = vld [vmem:[%s4702_s4 + $0x8] sm:$0xff] }
 0x1fb   : > { %v4395_v50 = vpop.permute.xlu0 %3043  ;;  %v1553_v54 = vrot.slane %v1423_v33, 7  ;;  %v1551_v56 = vrot.slane %v1351_v46, 7  ;;  %2698 = vmatprep.subr.mxu1 %v374_v14 }
 0x1fc   : > { %v3046_v2 = vunpack.i.h.bf16 %v4395_v50  ;;  %v3045_v60 = vunpack.i.l.bf16 %v4395_v50  ;;  %v1327_v50 = vsel %vm1311_vm4, %v1302_v37, %v3030_v61  ;;  %v3181_v61 = vld [vmem:[#allocation2 + $0xc8] sm:$0xff]  ;;  %2699 = vmatpush3.msra.mxu1 %v374_v14 }
 0x1fd   : > { %v4406_v35 = vpop.permute.xlu1 %3073  ;;  %v1552_v13 = vsel %vm1481_vm3, %v1543_v36, %v1551_v56  ;;  %v1377_v36 = vsel %vm627_vm0, %v4080_v28, %v3066_v59  ;;  %v373_v28 = vld [vmem:[%s4702_s4] sm:$0xff] }
 0x1fe   : > { %v4463_v6 = vsel %vm1336_vm5, %v1328_v29, %v3046_v2  ;;  %v1352_v31 = vsel %vm1336_vm5, %v1327_v50, %v3045_v60  ;;  %v3076_v20 = vunpack.i.h.bf16 %v4406_v35  ;;  %v3075_v21 = vunpack.i.l.bf16 %v4406_v35  ;;  %2700 = vmatprep.subr.mxu1 %v373_v28 }
 0x1ff   : > { %v4410_v57 = vpop.permute.xlu0 %3053  ;;  %v1558_v45 = vrot.slane %v4463_v6, 7  ;;  %v1376_v35 = vsel %vm627_vm0, %v4071_v8, %v3065_v47  ;;  %2701 = vmatpush3.msra.mxu1 %v373_v28 }
 0x200   : > { %v3056_v17 = vunpack.i.h.bf16 %v4410_v57  ;;  %v3055_v23 = vunpack.i.l.bf16 %v4410_v57 }
 0x201   : > { %v4425_v41 = vpop.permute.xlu1 %3078 }
 0x202   : > { %v3081_v57 = vunpack.i.h.bf16 %v4425_v41  ;;  %v1329_v33 = vsel %vm1311_vm4, %v1304_v40, %v3056_v17 }
 0x203   : > { %v3059_v48 = vpop.permute.xlu0 %3058 }
 0x204   : > { %v3061_v55 = vunpack.i.h.bf16 %v3059_v48  ;;  %v3060_v58 = vunpack.i.l.bf16 %v3059_v48  ;;  %v1557_v48 = vrot.slane %v1352_v31, 7  ;;  %v1401_v60 = vsel %vm1311_vm4, %v1377_v36, %v3081_v57 }
 0x205   : > { %v4440_v53 = vpop.permute.xlu1 %3083 }
 0x206   : > { %v1422_v62 = vsel %vm1336_vm5, %v1398_v52, %v3061_v55  ;;  %v1421_v12 = vsel %vm1336_vm5, %v1397_v63, %v3060_v58  ;;  %v3086_v30 = vunpack.i.h.bf16 %v4440_v53  ;;  %v1305_v55 = vsel %vm627_vm0, %v4060_v43, %v3070_v44 }
 0x207   : > { %v4444_v10 = vpop.permute.xlu0 %3093  ;;  %v1545_v3 = vrot.slane %v1421_v12, 7  ;;  %v1546_v27 = vrot.slane %v1422_v62, 7  ;;  %v3080_v58 = vunpack.i.l.bf16 %v4425_v41  ;;  %v1306_v52 = vsel %vm627_vm0, %v3181_v61, %v3071_v49 }
 0x208   : > { %v1330_v63 = vsel %vm1311_vm4, %v1305_v55, %v3075_v21  ;;  %v3085_v46 = vunpack.i.l.bf16 %v4440_v53  ;;  %v3096_v43 = vunpack.i.h.bf16 %v4444_v10  ;;  %v1331_v41 = vsel %vm1311_vm4, %v1306_v52, %v3076_v20  ;;  %v3183_v55 = vld [vmem:[#allocation2 + $0xe8] sm:$0xff] }
 0x209   : > { %v1547_v39 = vsel %vm1481_vm3, %v1545_v3, %v1546_v27  ;;  %v4455_v9 = vpop.permute.xlu1 %3088  ;;  %v1554_v15 = vsel %vm1481_vm3, %v1546_v27, %v1553_v54  ;;  %v1402_v62 = vsel %vm1311_vm4, %v1378_v24, %v3055_v23  ;;  %v1559_v2 = vsel %vm1481_vm3, %v1557_v48, %v1558_v45  ;;  %v3182_v54 = vld [vmem:[#allocation2 + $0xd0] sm:$0xff] }
 0x20a   : > { %1770 = vmatprep.mubr.f32.mxu0 %v1547_v39  ;;  %v3091_v5 = vunpack.i.h.bf16 %v4455_v9  ;;  %v3090_v8 = vunpack.i.l.bf16 %v4455_v9  ;;  %v1354_v3 = vsel %vm1336_vm5, %v1329_v33, %v3086_v30  ;;  %v1400_v38 = vsel %vm1311_vm4, %v1376_v35, %v3080_v58 }
 0x20b   : > { %1771 = vmatmul.mubr.f32.gmra.mxu0 %v1544_v25  ;;  %v4466_v16 = vpop.permute.xlu0 %3113  ;;  %v3095_v11 = vunpack.i.l.bf16 %v4444_v10  ;;  %v1426_v39 = vsel %vm1336_vm5, %v1402_v62, %v3085_v46  ;;  %v1307_v56 = vsel %vm627_vm0, %v3182_v54, %v3096_v43  ;;  %v1566_v34 = vrot.slane %v1354_v3, 7 }
 0x20c   : > { %1775 = vmatprep.mubr.f32.mxu0 %v1554_v15  ;;  %v4519_v4 = vsel %vm1336_vm5, %v1331_v41, %v3091_v5  ;;  %v1355_v37 = vsel %vm1336_vm5, %v1330_v63, %v3090_v8  ;;  %v3115_v59 = vunpack.i.l.bf16 %v4466_v16  ;;  %v3116_v47 = vunpack.i.h.bf16 %v4466_v16 }
 0x20d   : > { %v4479_v18 = vpop.permute.xlu1 %3098  ;;  %v1572_v42 = vrot.slane %v1355_v37, 7  ;;  %v1573_v40 = vrot.slane %v4519_v4, 7  ;;  %v1568_v20 = vrot.slane %v1426_v39, 7  ;;  %v1381_v21 = vsel %vm627_vm0, %v4099_v19, %v3095_v11  ;;  %v4721_v37 = vld [vmem:[#allocation13_spill] sm:$0xff] }
 0x20e   : > { %v3101_v31 = vunpack.i.h.bf16 %v4479_v18  ;;  %v3100_v24 = vunpack.i.l.bf16 %v4479_v18  ;;  %v1379_v16 = vsel %vm627_vm0, %v4109_v0, %v3115_v59  ;;  %v1567_v14 = vsel %vm1481_vm3, %v1558_v45, %v1566_v34 }
 0x20f   : > { %1776 = vmatmul.mubr.f32.gmra.mxu0 %v1552_v13  ;;  %v4494_v32 = vpop.permute.xlu0 %3118  ;;  %v1380_v35 = vsel %vm627_vm0, %v4116_v7, %v3116_v47  ;;  %v1574_v0 = vsel %vm1481_vm3, %v1572_v42, %v1573_v40 }
 0x210   : > { %v3121_v44 = vunpack.i.h.bf16 %v4494_v32  ;;  %v1332_v19 = vsel %vm1311_vm4, %v1307_v56, %v3101_v31  ;;  %v3120_v36 = vunpack.i.l.bf16 %v4494_v32  ;;  %v1405_v30 = vsel %vm1311_vm4, %v1381_v21, %v3100_v24 }
 0x211   : > { %v3104_v12 = vpop.permute.xlu1 %3103 }
 0x212   : > { %v3106_v53 = vunpack.i.h.bf16 %v3104_v12  ;;  %v3105_v27 = vunpack.i.l.bf16 %v3104_v12  ;;  %v1309_v6 = vsel %vm627_vm0, %v3183_v55, %v3121_v44  ;;  %v1308_v39 = vsel %vm627_vm0, %v4721_v37, %v3120_v36 }
 0x213   : > { %v3124_v1 = vpop.permute.xlu0 %3123 }
 0x214   : > { %v1425_v50 = vsel %vm1336_vm5, %v1401_v60, %v3106_v53  ;;  %v1424_v29 = vsel %vm1336_vm5, %v1400_v38, %v3105_v27  ;;  %v3126_v13 = vunpack.i.h.bf16 %v3124_v1  ;;  %v3125_v17 = vunpack.i.l.bf16 %v3124_v1 }
 0x215   : > { %v3109_v9 = vpop.permute.xlu1 %3108  ;;  %v1560_v25 = vrot.slane %v1424_v29, 7  ;;  %v1561_v10 = vrot.slane %v1425_v50, 7 }
 0x216   : > { %v1404_v5 = vsel %vm1311_vm4, %v1380_v35, %v3126_v13  ;;  %v1403_v7 = vsel %vm1311_vm4, %v1379_v16, %v3125_v17  ;;  %v3111_v8 = vunpack.i.h.bf16 %v3109_v9  ;;  %v3110_v28 = vunpack.i.l.bf16 %v3109_v9  ;;  %v4722_v35 = vld [vmem:[#allocation14_spill] sm:$0xff] }
 0x217   : > { %v3129_v15 = vpop.permute.xlu0 %3128  ;;  %v1562_v49 = vsel %vm1481_vm3, %v1560_v25, %v1561_v10  ;;  %v1569_v18 = vsel %vm1481_vm3, %v1561_v10, %v1568_v20 }
 0x218   : > { %v3130_v23 = vunpack.i.l.bf16 %v3129_v15  ;;  %1780 = vmatprep.mubr.f32.mxu0 %v1562_v49  ;;  %v3131_v48 = vunpack.i.h.bf16 %v3129_v15 }
 0x219   : > { %v3144_v26 = vpop.permute.xlu1 %3143  ;;  %1781 = vmatmul.mubr.f32.gmra.mxu0 %v1559_v2 }
 0x21a   : > { %1785 = vmatprep.mubr.f32.mxu0 %v1569_v18  ;;  %v1429_v32 = vsel %vm1336_vm5, %v1405_v30, %v3130_v23  ;;  %v1357_v61 = vsel %vm1336_vm5, %v1332_v19, %v3131_v48  ;;  %v3146_v2 = vunpack.i.h.bf16 %v3144_v26  ;;  %v3145_v60 = vunpack.i.l.bf16 %v3144_v26  ;;  %v3184_v48 = vld [vmem:[#allocation2 + $0xf0] sm:$0xff] }
 0x21b   : > { %v3134_v57 = vpop.permute.xlu0 %3133  ;;  %v1583_v53 = vrot.slane %v1429_v32, 7  ;;  %v1581_v29 = vrot.slane %v1357_v61, 7 }
 0x21c   : > { %v3136_v58 = vunpack.i.h.bf16 %v3134_v57  ;;  %v3135_v45 = vunpack.i.l.bf16 %v3134_v57 }
 0x21d   : > { %1786 = vmatmul.mubr.f32.gmra.mxu0 %v1567_v14  ;;  %v3154_v46 = vpop.permute.xlu1 %3153  ;;  %v1582_v21 = vsel %vm1481_vm3, %v1573_v40, %v1581_v29 }
 0x21e   : > { %v1428_v52 = vsel %vm1336_vm5, %v1404_v5, %v3136_v58  ;;  %v1427_v63 = vsel %vm1336_vm5, %v1403_v7, %v3135_v45  ;;  %v3156_v43 = vunpack.i.h.bf16 %v3154_v46  ;;  %v3155_v41 = vunpack.i.l.bf16 %v3154_v46  ;;  %v2672_v7 = vpop.f32.mrf.mxu1 }
 0x21f   : > { %v3139_v33 = vpop.permute.xlu0 %3138  ;;  %v1575_v62 = vrot.slane %v1427_v63, 7  ;;  %v1576_v12 = vrot.slane %v1428_v52, 7 }
 0x220   : > { %v3141_v3 = vunpack.i.h.bf16 %v3139_v33  ;;  %v1382_v27 = vsel %vm627_vm0, %v4142_v51, %v3155_v41  ;;  %v1383_v1 = vsel %vm627_vm0, %v4151_v22, %v3156_v43  ;;  %v3140_v38 = vunpack.i.l.bf16 %v3139_v33  ;;  %v1877_v61 = vpop.f32.mrf.mxu1 }
 0x221   : > { %v1577_v11 = vsel %vm1481_vm3, %v1575_v62, %v1576_v12  ;;  %v1406_v54 = vsel %vm1311_vm4, %v1382_v27, %v3110_v28  ;;  %v1407_v56 = vsel %vm1311_vm4, %v1383_v1, %v3111_v8  ;;  %v3159_v50 = vpop.permute.xlu1 %3158  ;;  %v1584_v51 = vsel %vm1481_vm3, %v1576_v12, %v1583_v53 }
 0x222   : > { %1790 = vmatprep.mubr.f32.mxu0 %v1577_v11  ;;  %v3161_v59 = vunpack.i.h.bf16 %v3159_v50  ;;  %v1430_v22 = vsel %vm1336_vm5, %v1406_v54, %v3145_v60  ;;  %v1431_v25 = vsel %vm1336_vm5, %v1407_v56, %v3146_v2  ;;  %v1334_v15 = vsel %vm1311_vm4, %v1309_v6, %v3141_v3  ;;  %v2675_v12 = vpop.f32.mrf.mxu1 }
 0x223   : > { %v3149_v9 = vpop.permute.xlu0 %3148  ;;  %1791 = vmatmul.mubr.f32.gmra.mxu0 %v1574_v0  ;;  %v1590_v47 = vrot.slane %v1430_v22, 7  ;;  %v1591_v31 = vrot.slane %v1431_v25, 7  ;;  %v1333_v42 = vsel %vm1311_vm4, %v1308_v39, %v3140_v38  ;;  %v3160_v24 = vunpack.i.l.bf16 %v3159_v50 }
 0x224   : > { %v3151_v10 = vunpack.i.h.bf16 %v3149_v9  ;;  %v3150_v34 = vunpack.i.l.bf16 %v3149_v9  ;;  %1795 = vmatprep.mubr.f32.mxu0 %v1584_v51  ;;  %v1310_v26 = vsel %vm627_vm0, %v3184_v48, %v3161_v59  ;;  %v1887_v53 = vpop.f32.mrf.mxu1 }
 0x225   : > { %v3169_v20 = vpop.permute.xlu1 %3168  ;;  %v1592_v13 = vsel %vm1481_vm3, %v1590_v47, %v1591_v31  ;;  %v1384_v19 = vsel %vm627_vm0, %v4722_v35, %v3160_v24 }
 0x226   : > { %v1358_v44 = vsel %vm1336_vm5, %v1333_v42, %v3150_v34  ;;  %v1359_v49 = vsel %vm1336_vm5, %v1334_v15, %v3151_v10  ;;  %v3171_v36 = vunpack.i.h.bf16 %v3169_v20  ;;  %v3170_v57 = vunpack.i.l.bf16 %v3169_v20  ;;  %v2678_v56 = vpop.f32.mrf.mxu1 }
 0x227   : > { %v3164_v17 = vpop.permute.xlu0 %3163  ;;  %1796 = vmatmul.mubr.f32.gmra.mxu0 %v1582_v21  ;;  %v1587_v23 = vrot.slane %v1358_v44, 7  ;;  %v1588_v16 = vrot.slane %v1359_v49, 7 }
 0x228   : > { %v3166_v18 = vunpack.i.h.bf16 %v3164_v17  ;;  %v3165_v14 = vunpack.i.l.bf16 %v3164_v17  ;;  %1800 = vmatprep.mubr.f32.mxu0 %v1592_v13  ;;  %v1897_v9 = vpop.f32.mrf.mxu1 }
 0x229   : > { %v1589_v4 = vsel %vm1481_vm3, %v1587_v23, %v1588_v16 }
 0x22a   : > { %v1335_v40 = vsel %vm1311_vm4, %v1310_v26, %v3166_v18  ;;  %v1408_v0 = vsel %vm1311_vm4, %v1384_v19, %v3165_v14  ;;  %v2681_v15 = vpop.f32.mrf.mxu1 }
 0x22b   : > { %1801 = vmatmul.mubr.f32.gmra.mxu0 %v1589_v4  ;;  %v1432_v30 = vsel %vm1336_vm5, %v1408_v0, %v3170_v57  ;;  %v1360_v55 = vsel %vm1336_vm5, %v1335_v40, %v3171_v36 }
 0x22c   : > { %v1598_v6 = vrot.slane %v1432_v30, 7  ;;  %v1596_v58 = vrot.slane %v1360_v55, 7  ;;  %v1907_v49 = vpop.f32.mrf.mxu1 }
 0x22e   : > { %v1599_v45 = vsel %vm1481_vm3, %v1591_v31, %v1598_v6  ;;  %v1597_v5 = vsel %vm1481_vm3, %v1588_v16, %v1596_v58  ;;  %v2684_v26 = vpop.f32.mrf.mxu1 }
 0x22f   : > { %1805 = vmatprep.mubr.f32.mxu0 %v1599_v45 }
 0x230   : > { %1806 = vmatmul.mubr.f32.gmra.mxu0 %v1597_v5  ;;  %v1917_v19 = vpop.f32.mrf.mxu1 }
 0x232   : > { %v2687_v6 = vpop.f32.mrf.mxu1 }
 0x283   : > { %v2480_v8 = vpop.f32.mrf.mxu0 }
 0x285   : > { %v2481_v32 = vpop.f32.mrf.mxu0 }
 0x286   : > { %v2482_v28 = vadd.f32 %v2481_v32, %v2480_v8 }
 0x287   : > { %v2483_v52 = vpop.f32.mrf.mxu0 }
 0x288   : > { %v1878_v63 = vadd.f32 %v2482_v28, %v1877_v61 }
 0x289   : > { %v2484_v46 = vpop.f32.mrf.mxu0 }
 0x28a   : > { %v1956_v43 = vmax.f32 %v1878_v63, 0.0  ;;  %v2485_v41 = vadd.f32 %v2484_v46, %v2483_v52 }
 0x28c   : > { %v1883_v33 = vadd.f32 %v2672_v7, %v2485_v41  ;;  %2702 = vmatprep.mubr.msk.f32.mxu1 %vm627_vm0, %v1956_v43  ;;  %v1927_v7 = vpop.f32.mrf.mxu1 }
 0x28e   : > { %v1957_v62 = vmax.f32 %v1883_v33, 0.0  ;;  %v2690_v63 = vpop.f32.mrf.mxu1 }
 0x290   : > { %2703 = vmatmul.mubr.msk.f32.vlgmr.msra.gmra.mxu1 %vm627_vm0, %v1957_v62 }
 0x291   : > { %v2486_v2 = vpop.f32.mrf.mxu0 }
 0x293   : > { %v2487_v60 = vpop.f32.mrf.mxu0 }
 0x294   : > { %v2488_v3 = vadd.f32 %v2487_v60, %v2486_v2 }
 0x295   : > { %v2489_v27 = vpop.f32.mrf.mxu0 }
 0x296   : > { %v1888_v1 = vadd.f32 %v2488_v3, %v1887_v53 }
 0x297   : > { %v2490_v38 = vpop.f32.mrf.mxu0 }
 0x298   : > { %v1958_v11 = vmax.f32 %v1888_v1, 0.0  ;;  %v2491_v37 = vadd.f32 %v2490_v38, %v2489_v27 }
 0x29a   : > { %v1893_v39 = vadd.f32 %v2675_v12, %v2491_v37  ;;  %2705 = vmatprep.mubr.msk.f32.mxu1 %vm627_vm0, %v1958_v11  ;;  %v1937_v12 = vpop.f32.mrf.mxu1 }
 0x29c   : > { %v1959_v54 = vmax.f32 %v1893_v39, 0.0  ;;  %v2693_v1 = vpop.f32.mrf.mxu1 }
 0x29e   : > { %2706 = vmatmul.mubr.msk.f32.gmra.mxu1 %vm627_vm0, %v1959_v54 }
 0x2a7   : > { %v2492_v50 = vpop.f32.mrf.mxu0 }
 0x2a9   : > { %v2493_v29 = vpop.f32.mrf.mxu0 }
 0x2aa   : > { %v2494_v59 = vadd.f32 %v2493_v29, %v2492_v50 }
 0x2ab   : > { %v2495_v51 = vpop.f32.mrf.mxu0 }
 0x2ac   : > { %v1898_v22 = vadd.f32 %v2494_v59, %v1897_v9 }
 0x2ad   : > { %v2496_v25 = vpop.f32.mrf.mxu0 }
 0x2ae   : > { %v1960_v10 = vmax.f32 %v1898_v22, 0.0  ;;  %v2497_v34 = vadd.f32 %v2496_v25, %v2495_v51 }
 0x2b0   : > { %v1903_v47 = vadd.f32 %v2678_v56, %v2497_v34  ;;  %2708 = vmatprep.mubr.msk.f32.mxu1 %vm627_vm0, %v1960_v10  ;;  %v1947_v56 = vpop.f32.mrf.mxu1  ;;  %v3185_v34 = vld [vmem:[%s3526_s29 + $0x8] sm:$0xff] }
 0x2b2   : > { %v1961_v31 = vmax.f32 %v1903_v47, 0.0 }
 0x2b4   : > { %2709 = vmatmul.mubr.msk.f32.gmra.mxu1 %vm627_vm0, %v1961_v31 }
 0x2b5   : > { %v2498_v42 = vpop.f32.mrf.mxu0 }
 0x2b7   : > { %v2499_v24 = vpop.f32.mrf.mxu0 }
 0x2b8   : > { %v2500_v44 = vadd.f32 %v2499_v24, %v2498_v42  ;;  %v3186_v42 = vld [vmem:[%s3526_s29] sm:$0xff] }
 0x2b9   : > { %v2501_v20 = vpop.f32.mrf.mxu0 }
 0x2ba   : > { %v1908_v21 = vadd.f32 %v2500_v44, %v1907_v49 }
 0x2bb   : > { %v2502_v13 = vpop.f32.mrf.mxu0 }
 0x2bc   : > { %v1962_v17 = vmax.f32 %v1908_v21, 0.0  ;;  %v2503_v23 = vadd.f32 %v2502_v13, %v2501_v20  ;;  %v3187_v20 = vld [vmem:[%s3526_s29 + $0x18] sm:$0xff] }
 0x2be   : > { %v1913_v16 = vadd.f32 %v2681_v15, %v2503_v23  ;;  %2711 = vmatprep.mubr.msk.f32.mxu1 %vm627_vm0, %v1962_v17  ;;  %v3188_v23 = vld [vmem:[%s3526_s29 + $0x10] sm:$0xff] }
 0x2c0   : > { %v1963_v48 = vmax.f32 %v1913_v16, 0.0 }
 0x2c2   : > { %2712 = vmatmul.mubr.msk.f32.gmra.mxu1 %vm627_vm0, %v1963_v48 }
 0x2cb   : > { %v2504_v18 = vpop.f32.mrf.mxu0 }
 0x2cd   : > { %v2505_v14 = vpop.f32.mrf.mxu0 }
 0x2ce   : > { %v2506_v35 = vadd.f32 %v2505_v14, %v2504_v18  ;;  %v3189_v18 = vld [vmem:[%s3526_s29 + $0x28] sm:$0xff] }
 0x2cf   : > { %v2507_v36 = vpop.f32.mrf.mxu0 }
 0x2d0   : > { %v1918_v57 = vadd.f32 %v2506_v35, %v1917_v19 }
 0x2d1   : > { %v2508_v4 = vpop.f32.mrf.mxu0 }
 0x2d2   : > { %v1964_v40 = vmax.f32 %v1918_v57, 0.0  ;;  %v2509_v0 = vadd.f32 %v2508_v4, %v2507_v36  ;;  %v3190_v36 = vld [vmem:[%s3526_s29 + $0x20] sm:$0xff] }
 0x2d4   : > { %v1923_v30 = vadd.f32 %v2684_v26, %v2509_v0  ;;  %2714 = vmatprep.mubr.msk.f32.mxu1 %vm627_vm0, %v1964_v40  ;;  %v3191_v0 = vld [vmem:[%s3526_s29 + $0x38] sm:$0xff] }
 0x2d6   : > { %v1965_v55 = vmax.f32 %v1923_v30, 0.0 }
 0x2d8   : > { %2715 = vmatmul.mubr.msk.f32.gmra.mxu1 %vm627_vm0, %v1965_v55 }
 0x2d9   : > { %v2510_v58 = vpop.f32.mrf.mxu0 }
 0x2db   : > { %v2511_v45 = vpop.f32.mrf.mxu0 }
 0x2dc   : > { %v2512_v5 = vadd.f32 %v2511_v45, %v2510_v58  ;;  %v3192_v58 = vld [vmem:[%s3526_s29 + $0x30] sm:$0xff] }
 0x2dd   : > { %v2513_v8 = vpop.f32.mrf.mxu0 }
 0x2de   : > { %v1928_v32 = vadd.f32 %v2512_v5, %v1927_v7 }
 0x2df   : > { %v2514_v28 = vpop.f32.mrf.mxu0 }
 0x2e0   : > { %v1966_v61 = vmax.f32 %v1928_v32, 0.0  ;;  %v2515_v52 = vadd.f32 %v2514_v28, %v2513_v8  ;;  %v3193_v8 = vld [vmem:[%s3526_s29 + $0x48] sm:$0xff] }
 0x2e2   : > { %v1933_v46 = vadd.f32 %v2687_v6, %v2515_v52  ;;  %2717 = vmatprep.mubr.msk.f32.mxu1 %vm627_vm0, %v1966_v61  ;;  %v3194_v52 = vld [vmem:[%s3526_s29 + $0x40] sm:$0xff] }
 0x2e3   : > { %v2516_v43 = vpop.f32.mrf.mxu0 }
 0x2e4   : > { %v1967_v41 = vmax.f32 %v1933_v46, 0.0 }
 0x2e5   : > { %v2517_v33 = vpop.f32.mrf.mxu0 }
 0x2e6   : > { %v2518_v62 = vadd.f32 %v2517_v33, %v2516_v43  ;;  %2718 = vmatmul.mubr.msk.f32.gmra.mxu1 %vm627_vm0, %v1967_v41  ;;  %v3195_v41 = vld [vmem:[%s3526_s29 + $0x58] sm:$0xff] }
 0x2e7   : > { %v2519_v2 = vpop.f32.mrf.mxu0 }
 0x2e8   : > { %v1938_v60 = vadd.f32 %v2518_v62, %v1937_v12 }
 0x2e9   : > { %v2520_v3 = vpop.f32.mrf.mxu0 }
 0x2ea   : > { %v1968_v53 = vmax.f32 %v1938_v60, 0.0  ;;  %v2521_v27 = vadd.f32 %v2520_v3, %v2519_v2  ;;  %v3196_v2 = vld [vmem:[%s3526_s29 + $0x50] sm:$0xff] }
 0x2eb   : > { %v2522_v38 = vpop.f32.mrf.mxu0 }
 0x2ec   : > { %v1943_v11 = vadd.f32 %v2690_v63, %v2521_v27  ;;  %2720 = vmatprep.mubr.msk.f32.mxu1 %vm627_vm0, %v1968_v53  ;;  %v3197_v27 = vld [vmem:[%s3526_s29 + $0x68] sm:$0xff] }
 0x2ed   : > { %v2523_v37 = vpop.f32.mrf.mxu0 }
 0x2ee   : > { %v1969_v39 = vmax.f32 %v1943_v11, 0.0  ;;  %v2524_v54 = vadd.f32 %v2523_v37, %v2522_v38  ;;  %v3198_v37 = vld [vmem:[%s3526_s29 + $0x60] sm:$0xff] }
 0x2f0   : > { %v1948_v50 = vadd.f32 %v2524_v54, %v1947_v56  ;;  %v2525_v29 = vpop.f32.mrf.mxu0  ;;  %2721 = vmatmul.mubr.msk.f32.gmra.mxu1 %vm627_vm0, %v1969_v39 }
 0x2f2   : > { %v1970_v59 = vmax.f32 %v1948_v50, 0.0  ;;  %v2526_v9 = vpop.f32.mrf.mxu0  ;;  %v3199_v50 = vld [vmem:[%s3526_s29 + $0x78] sm:$0xff] }
 0x2f3   : > { %v2527_v51 = vadd.f32 %v2526_v9, %v2525_v29 }
 0x2f4   : > { %2723 = vmatprep.mubr.msk.f32.mxu1 %vm627_vm0, %v1970_v59 }
 0x2f5   : > { %v1953_v22 = vadd.f32 %v2693_v1, %v2527_v51  ;;  %v3200_v51 = vld [vmem:[%s3526_s29 + $0x70] sm:$0xff]  ;;  %s3334_s29 = smov [#allocation6]  }
 0x2f6   : > { %s3233_s11 = sshll.u32 %s3334_s29, 4  ;;  %s3234_s11 = int_to_ptr.vmem [resolvable:$false] %s3233_s11 }
 0x2f7   : > { %v1971_v25 = vmax.f32 %v1953_v22, 0.0  ;;  %s3235_s30 = scalar_lea.vmem %s3234_s11, 4096  ;;  %p3236_p3 = scmp.lt.s32.totalorder %s4638_s6, %s3234_s11 }
 0x2f8   : > { %p3237_p6 = scmp.lt.s32.totalorder %s3235_s30, %s3229_s10 }
 0x2f9   : > { %2724 = vmatmul.mubr.msk.f32.gmra.mxu1 %vm627_vm0, %v1971_v25 }
 0x2fa   : > { %p3238_p7 = por %p3237_p6, %p3236_p3 }
 0x2fc   : > { %p3239_p10 = pnand %p3238_p7, %p3232_p5 }
 0x350   : > { %v2704_v10 = vpop.f32.mrf.mxu1 }
 0x351   : > { %v2166_v47 = vadd.f32 %v3185_v34, %v2704_v10 }
 0x352   : > { %v2086_v31 = vpop.f32.mrf.mxu1 }
 0x353   : > { %v2182_v15 = vmax.f32 %v2166_v47, 0.0  ;;  %v2165_v24 = vadd.f32 %v3186_v42, %v2086_v31 }
 0x355   : > { %2198 = vst [vmem:[%s4605_s18 + $0x8] sm:$0xff] %v2182_v15  ;;  %v2181_v44 = vmax.f32 %v2165_v24, 0.0 }
 0x357   : > { %2197 = vst [vmem:[%s4605_s18] sm:$0xff] %v2181_v44 }
 0x35e   : > { %v2707_v49 = vpop.f32.mrf.mxu1 }
 0x35f   : > { %v2168_v21 = vadd.f32 %v3187_v20, %v2707_v49 }
 0x360   : > { %v2096_v13 = vpop.f32.mrf.mxu1 }
 0x361   : > { %v2184_v17 = vmax.f32 %v2168_v21, 0.0  ;;  %v2167_v16 = vadd.f32 %v3188_v23, %v2096_v13 }
 0x363   : > { %2200 = vst [vmem:[%s4605_s18 + $0x18] sm:$0xff] %v2184_v17  ;;  %v2183_v48 = vmax.f32 %v2167_v16, 0.0 }
 0x365   : > { %2199 = vst [vmem:[%s4605_s18 + $0x10] sm:$0xff] %v2183_v48 }
 0x374   : > { %v2710_v26 = vpop.f32.mrf.mxu1 }
 0x375   : > { %v2170_v14 = vadd.f32 %v3189_v18, %v2710_v26 }
 0x376   : > { %v2106_v35 = vpop.f32.mrf.mxu1 }
 0x377   : > { %v2186_v19 = vmax.f32 %v2170_v14, 0.0  ;;  %v2169_v57 = vadd.f32 %v3190_v36, %v2106_v35 }
 0x379   : > { %2202 = vst [vmem:[%s4605_s18 + $0x28] sm:$0xff] %v2186_v19  ;;  %v2185_v4 = vmax.f32 %v2169_v57, 0.0 }
 0x37b   : > { %2201 = vst [vmem:[%s4605_s18 + $0x20] sm:$0xff] %v2185_v4 }
 0x382   : > { %v2713_v40 = vpop.f32.mrf.mxu1 }
 0x383   : > { %v2172_v30 = vadd.f32 %v3191_v0, %v2713_v40 }
 0x384   : > { %v2116_v55 = vpop.f32.mrf.mxu1 }
 0x385   : > { %v2188_v6 = vmax.f32 %v2172_v30, 0.0  ;;  %v2171_v45 = vadd.f32 %v3192_v58, %v2116_v55 }
 0x387   : > { %2204 = vst [vmem:[%s4605_s18 + $0x38] sm:$0xff] %v2188_v6  ;;  %v2187_v5 = vmax.f32 %v2171_v45, 0.0 }
 0x389   : > { %2203 = vst [vmem:[%s4605_s18 + $0x30] sm:$0xff] %v2187_v5 }
 0x398   : > { %v2716_v7 = vpop.f32.mrf.mxu1 }
 0x399   : > { %v2174_v32 = vadd.f32 %v3193_v8, %v2716_v7 }
 0x39a   : > { %v2126_v28 = vpop.f32.mrf.mxu1 }
 0x39b   : > { %v2190_v61 = vmax.f32 %v2174_v32, 0.0  ;;  %v2173_v63 = vadd.f32 %v3194_v52, %v2126_v28 }
 0x39d   : > { %2206 = vst [vmem:[%s4605_s18 + $0x48] sm:$0xff] %v2190_v61  ;;  %v2189_v46 = vmax.f32 %v2173_v63, 0.0 }
 0x39f   : > { %2205 = vst [vmem:[%s4605_s18 + $0x40] sm:$0xff] %v2189_v46 }
 0x3a6   : > { %v2719_v43 = vpop.f32.mrf.mxu1 }
 0x3a7   : > { %v2176_v33 = vadd.f32 %v3195_v41, %v2719_v43 }
 0x3a8   : > { %v2136_v62 = vpop.f32.mrf.mxu1 }
 0x3a9   : > { %v2192_v12 = vmax.f32 %v2176_v33, 0.0  ;;  %v2175_v60 = vadd.f32 %v3196_v2, %v2136_v62 }
 0x3ab   : > { %2208 = vst [vmem:[%s4605_s18 + $0x58] sm:$0xff] %v2192_v12  ;;  %v2191_v3 = vmax.f32 %v2175_v60, 0.0 }
 0x3ad   : > { %2207 = vst [vmem:[%s4605_s18 + $0x50] sm:$0xff] %v2191_v3 }
 0x3b0   : > { %v2722_v53 = vpop.f32.mrf.mxu1 }
 0x3b1   : > { %v2178_v1 = vadd.f32 %v3197_v27, %v2722_v53 }
 0x3b2   : > { %v2146_v38 = vpop.f32.mrf.mxu1 }
 0x3b3   : > { %v2194_v11 = vmax.f32 %v2178_v1, 0.0  ;;  %v2177_v39 = vadd.f32 %v3198_v37, %v2146_v38 }
 0x3b5   : > { %2210 = vst [vmem:[%s4605_s18 + $0x68] sm:$0xff] %v2194_v11  ;;  %v2193_v54 = vmax.f32 %v2177_v39, 0.0 }
 0x3b7   : > { %2209 = vst [vmem:[%s4605_s18 + $0x60] sm:$0xff] %v2193_v54 }
 0x3b9   : > { %v2725_v56 = vpop.f32.mrf.mxu1 }
 0x3ba   : > { %v2180_v29 = vadd.f32 %v3199_v50, %v2725_v56 }
 0x3bb   : > { %v2156_v59 = vpop.f32.mrf.mxu1 }
 0x3bc   : > { %v2196_v9 = vmax.f32 %v2180_v29, 0.0  ;;  %v2179_v22 = vadd.f32 %v3200_v51, %v2156_v59 }
 0x3be   : > { %2212 = vst [vmem:[%s4605_s18 + $0x78] sm:$0xff] %v2196_v9  ;;  %v2195_v25 = vmax.f32 %v2179_v22, 0.0 }
 0x3c0   : > { %2211 = vst [vmem:[%s4605_s18 + $0x70] sm:$0xff] %v2195_v25 }
 0x3c1   : > { %3242 = shalt.err (!%p3239_p10)
}
 0x3c2   : > { %s3243_s8 = scalar_lea.hbm %s4644_s7, 2048  ;;  %s3247_s18 = scalar_lea.hbm %s4703_s5, 8192 }
 0x3c3   : > { %p3244_p11 = scmp.ne.s32.totalorder %s4644_s7, %s3243_s8  ;;  %p3248_p8 = scmp.lt.s32.totalorder %s4644_s7, %s4703_s5 }
 0x3c4   : > { %p3249_p0 = scmp.lt.s32.totalorder %s3247_s18, %s3243_s8 }
 0x3c5   : > { %p3245_p13 = pnand %p3244_p11, %p3432_p9 }
 0x3c6   : > { %p3250_p2 = por %p3249_p0, %p3248_p8 }
 0x3c7   : > { %p3246_p1 = pneg %p3245_p13 }
 0x3c9   : > { %p3251_p4 = pnand %p3250_p2, %p3246_p1 }
 0x3cb   : > { %3254 = shalt.err (!%p3251_p4)
}
 0x3cc   : > { %s3335_s27 = smov 128   ;;  %s3336_s26 = smov 8  }
 0x3cd   : > { %2728 = dma.vmem_to_hbm [thread:$0]  (%p3432_p9), %s4638_s6, 2048, %s4644_s7, %s2214_s23, %s3335_s27, %s3335_s27, %s3336_s26  }
 0x3ce PF: > { %s4723_s21 = sld [smem:[#allocation9_spill]]  ;;  %p2739_p5 = scmp.ge.s32.totalorder %s3325_s25, 2 }
 0x3d0   : > { %p2735_p3 = pnand %p2739_p5, %p3438_p12 }
 0x3d2   : > { %p2736_p6 = pneg %p2735_p3 }
 0x3d4   : > { %s2245_s22 = sand.u32 1, %s4723_s21  }
 0x3d5   : > { %s2246_s10 = scalar_lea.sflag [#allocation5], %s2245_s22 }
 0x3d6   : > { %3292 = dma.done.wait (%p2736_p6), %s2246_s10, 2048  }
 0x3d7   : > { %3294 = vsyncadd (%p2736_p6), %s2246_s10, 4294965248  ;;  %s21_s25 = sadd.s32 1, %s3325_s25   ;;  %s4724_s21 = sld [smem:[#allocation10_spill]] }
 0x3d8   : > { %p18_p7 = scmp.ge.s32.totalorder %s21_s25, 6   ;;  %s4725_s23 = sld [smem:[#allocation11_spill]] }
 0x3d9   : > { %s4726_s9 = sld [smem:[#allocation12_spill]]  ;;  %s4727_s18 = smov %s3301_s19 }
 0x3da   : > { %s4728_s19 = smov %s3305_s20  ;;  %s4729_s20 = smov %s3445_s14 }
 0x3db   : > { %s4730_s22 = smov %s3321_s24  ;;  %20 = sbr.rel (!%p18_p7) target bundleno = 7 (0x7), region = 90 }
 0x3df   : > { %s4731_s24 = smov %s4726_s9 }
 0x3e0   :  { %2251 = vsyncpa [#allocation4], 1 }
 0x3e1   :  { %2253 = vsyncpa [#allocation4 + $0x1], 1 }
 0x3e2   :  { %2254 = vsyncpa [#allocation5], 1 }
 0x3e3   :  { %2256 = vsyncpa [#allocation5 + $0x1], 1 }

</bundles_post_ra>
